<compile_context>
chip_gen: v6e
topology: v6e:2x2x1
jax: 0.10.0
libtpu: 0.0.40
codegen_flags: <defaults>
</compile_context>

<pallas_src>
import functools

import jax
import jax.numpy as jnp
from jax.experimental import pallas as pl
from jax.experimental.pallas import tpu as pltpu


def _round_up(x, m):
    return (x + m - 1) // m * m


def _layout_bytes(shape, itemsize):
    """Approximate VMEM bytes of an array, accounting for (8, 128) tile padding."""
    if len(shape) == 1:
        return _round_up(shape[0], 128) * itemsize
    lead = 1
    for d in shape[:-2]:
        lead *= d
    return lead * _round_up(shape[-2], 8) * _round_up(shape[-1], 128) * itemsize


def _pick_tile_and_vmem(*, OH, OW, Hp, Wp, Cin, K, Cout, in_itemsize, out_itemsize,
                        max_tile_m):
    """Largest OH tile whose per-step VMEM footprint fits a conservative budget."""
    budget = 40 * 1024 * 1024   # fits v7x's 64 MiB physical VMEM with headroom

    def step_bytes(t):
        m = t * OW
        return int(
            2 * _layout_bytes((Hp, Wp, Cin), in_itemsize)     # padded image (dbl-buffered)
            + 2 * _layout_bytes((Cout, K), in_itemsize)       # weights (dbl-buffered)
            + 2 * _layout_bytes((Cout, 1), 4)                 # bias
            + 2 * _layout_bytes((1, Cout, m), out_itemsize)   # output tile (dbl-buffered)
            + _layout_bytes((Cout, m), 4)                     # f32 dot result
            + 2 * _layout_bytes((m, K), in_itemsize))         # im2col patches (+ temps)

    # Valid tiles: divisors of OH whose lane extent is 128-aligned (or the full dim).
    candidates = [t for t in range(1, OH + 1)
                  if OH % t == 0 and ((t * OW) % 128 == 0 or t == OH)]
    good = [t for t in candidates
            if t * OW <= max_tile_m and step_bytes(t) <= budget]
    tile_oh = max(good) if good else min(candidates)   # best effort if nothing fits
    est = step_bytes(tile_oh)
    vmem_limit = int(min(max(32 * 1024 * 1024, 2 * est), 96 * 1024 * 1024))
    return tile_oh, vmem_limit


# ----------------------------- Pallas kernel ---------------------------------
def _conv_kernel(x_ref, w_ref, b_ref, o_ref, *, TILE_OH, OW, KH, KW, sh, sw):
    """One grid step = one batch element x one tile of TILE_OH output rows.

    x_ref: (1, Hp, Wp, Cin)       zero-padded NHWC image (compute dtype); its block
                                  index is constant over the tile axis -> DMA'd once
                                  per batch element and kept resident.
    w_ref: (Cout, KH*KW*Cin)      weights, K ordered (kh, kw, cin)
    b_ref: (Cout, 1)              bias column (f32)
    o_ref: (1, Cout, TILE_OH*OW)  output tile, spatial dim lane-dense (NCHW-adjacent)
    """
    cin = x_ref.shape[-1]
    tile_m = TILE_OH * OW
    K = KH * KW * cin

    j = pl.program_id(1)
    row0 = j * (TILE_OH * sh)
    if (TILE_OH * sh) % 8 == 0:
        row0 = pl.multiple_of(row0, 8)

    # Fused im2col: gather the KH*KW shifted windows once per step and fold every tap
    # into a single MXU contraction of depth KH*KW*Cin (instead of KH*KW matmuls of
    # depth Cin). The (TILE_M, K) reshape happens once, outside the tap loop.
    slabs = []
    for kh in range(KH):
        for kw in range(KW):
            if sh == 1 and sw == 1:
                slab = x_ref[0, pl.ds(row0 + kh, TILE_OH), pl.ds(kw, OW), :]
            else:
                # TODO(synk): strided window reads are untested on real v5e hardware.
                slab = x_ref[0,
                             pl.ds(row0 + kh, TILE_OH, stride=sh),
                             pl.ds(kw, OW, stride=sw), :]
            slabs.append(slab)                                 # (TILE_OH, OW, Cin)
    patches = jnp.concatenate(slabs, axis=-1)                  # (TILE_OH, OW, K)
    patches = patches.reshape(tile_m, K)                       # single relayout / step

    # Transposed formulation: out (Cout, TILE_M) = W (Cout, K) @ patches^T (K, TILE_M).
    # The MXU lane (N) dimension is the spatial tile (multiple of 128), so a small
    # active_out count neither pads the MXU nor the HBM writeback.
    acc = jax.lax.dot_general(
        w_ref[...], patches,
        dimension_numbers=(((1,), (1,)), ((), ())),
        preferred_element_type=jnp.float32)                    # (Cout, TILE_M) f32
    o_ref[0] = (acc + b_ref[...]).astype(o_ref.dtype)


def _fused_conv2d(xp, w2, b2, *, OH, OW, KH, KW, sh, sw, tile_oh, out_dtype,
                  vmem_limit, cost):
    """xp: (N, Hp, Wp, Cin); w2: (Cout, KH*KW*Cin); b2: (Cout, 1) f32."""
    N, Hp, Wp, Cin = xp.shape
    Cout, K = w2.shape
    M = OH * OW
    tile_m = tile_oh * OW
    n_tiles = OH // tile_oh

    kernel = functools.partial(_conv_kernel, TILE_OH=tile_oh, OW=OW, KH=KH, KW=KW,
                               sh=sh, sw=sw)

    return pl.pallas_call(
        kernel,
        out_shape=jax.ShapeDtypeStruct((N, Cout, M), out_dtype),
        grid_spec=pltpu.PrefetchScalarGridSpec(
            num_scalar_prefetch=0,
            grid=(N, n_tiles),
            in_specs=[
                # Full padded image; block index constant over the tile axis.
                pl.BlockSpec((1, Hp, Wp, Cin), lambda n, j: (n, 0, 0, 0)),
                # Weight / bias block indices are constant -> DMA'd once. (Default
                # double-buffering only costs a few KiB here; pl.Buffered(1) would
                # reclaim it if VMEM ever got tight.)
                pl.BlockSpec((Cout, K), lambda n, j: (0, 0)),
                pl.BlockSpec((Cout, 1), lambda n, j: (0, 0)),
            ],
            out_specs=pl.BlockSpec((1, Cout, tile_m), lambda n, j: (n, 0, j)),
        ),
        compiler_params=pltpu.CompilerParams(
            dimension_semantics=("parallel", "parallel"),
            vmem_limit_bytes=vmem_limit,
        ),
        cost_estimate=cost,
    )(xp, w2, b2)


# ------------------------- jitted functional forward --------------------------
@functools.partial(
    jax.jit,
    static_argnames=("kernel_size", "stride", "padding", "compute_dtype", "max_tile_m"))
def _dynamic_conv2d_forward(x_nchw, weight, bias, *, kernel_size, stride, padding,
                            compute_dtype, max_tile_m):
    KH, KW = kernel_size
    sh, sw = stride
    ph, pw = padding
    cout_a, cin_a, _, _ = weight.shape
    N, _, H, W = x_nchw.shape
    OH = (H + 2 * ph - KH) // sh + 1
    OW = (W + 2 * pw - KW) // sw + 1
    K = KH * KW * cin_a
    cdt = jnp.dtype(compute_dtype)
    out_dtype = x_nchw.dtype

    # --- glue: NCHW -> padded NHWC (one fused XLA prep pass around the custom call)
    x = jnp.transpose(x_nchw, (0, 2, 3, 1)).astype(cdt)
    xp = jnp.pad(x, ((0, 0), (ph, ph), (pw, pw), (0, 0)))
    Hp, Wp = H + 2 * ph, W + 2 * pw

    # weight OIHW -> (Cout, KH*KW*Cin) with K ordered (kh, kw, cin); no channel padding.
    w2 = jnp.transpose(weight, (0, 2, 3, 1)).reshape(cout_a, K).astype(cdt)
    b = bias if bias is not None else jnp.zeros((cout_a,), jnp.float32)
    b2 = b.astype(jnp.float32).reshape(cout_a, 1)

    tile_oh, vmem_limit = _pick_tile_and_vmem(
        OH=OH, OW=OW, Hp=Hp, Wp=Wp, Cin=cin_a, K=K, Cout=cout_a,
        in_itemsize=cdt.itemsize, out_itemsize=jnp.dtype(out_dtype).itemsize,
        max_tile_m=max_tile_m)

    # Advisory cost, counting only un-padded useful work.
    cost = pl.CostEstimate(
        flops=2 * N * OH * OW * K * cout_a,
        transcendentals=0,
        bytes_accessed=int(x_nchw.size * x_nchw.dtype.itemsize
                           + weight.size * weight.dtype.itemsize
                           + b.size * 4
                           + N * cout_a * OH * OW * jnp.dtype(out_dtype).itemsize))

    out = _fused_conv2d(xp, w2, b2, OH=OH, OW=OW, KH=KH, KW=KW, sh=sh, sw=sw,
                        tile_oh=tile_oh, out_dtype=out_dtype,
                        vmem_limit=vmem_limit, cost=cost)        # (N, Cout, OH*OW)

    # Already NCHW-adjacent: just split the lane-dense spatial dim. No transpose.
    return out.reshape(N, cout_a, OH, OW)


# ----------------------------- Module wrapper ---------------------------------
class DynamicConv2dPallas:
    """Mirrors netaug DynamicConv2d (groups=1, dilation=1, padding_mode='zeros').

    compute_dtype="bfloat16" (default) runs MXU-native bf16 inputs with f32
    accumulation (~1e-2 abs error vs f32 torch); pass "float32" for exact parity.
    """

    def __init__(self, in_channels, out_channels, kernel_size, stride=1,
                 padding=0, bias=True, compute_dtype="bfloat16", max_tile_m=4096,
                 key=jax.random.PRNGKey(0)):
        kh, kw = (kernel_size, kernel_size) if isinstance(kernel_size, int) else kernel_size
        self.kernel_size = (kh, kw)
        self.stride = (stride, stride) if isinstance(stride, int) else tuple(stride)
        self.padding = (padding, padding) if isinstance(padding, int) else tuple(padding)
        self.in_channels = in_channels
        self.out_channels = out_channels
        self.compute_dtype = compute_dtype
        self.max_tile_m = max_tile_m
        # deterministic init (kaiming-uniform-like range, same shapes as nn.Conv2d)
        kw_, kb_ = jax.random.split(key)
        fan_in = in_channels * kh * kw
        bound = 1.0 / (fan_in ** 0.5)
        self.weight = jax.random.uniform(
            kw_, (out_channels, in_channels, kh, kw), jnp.float32, -bound, bound)  # OIHW
        self.bias = (jax.random.uniform(kb_, (out_channels,), jnp.float32, -bound, bound)
                     if bias else None)
        # dynamic sub-network state
        self.active_in_channels = in_channels
        self.active_out_channels = out_channels

    @property
    def active_weight(self):
        return self.weight[:self.active_out_channels, :self.active_in_channels]

    @property
    def active_bias(self):
        if self.bias is None:
            return None
        return self.bias[:self.active_out_channels]

    def __call__(self, x_nchw, max_tile_m=None):
        if x_nchw.shape[1] != self.active_in_channels:
            raise ValueError("Your set active method has some bugs in Conv2d.")
        return _dynamic_conv2d_forward(
            x_nchw, self.active_weight, self.active_bias,
            kernel_size=self.kernel_size, stride=self.stride, padding=self.padding,
            compute_dtype=self.compute_dtype,
            max_tile_m=self.max_tile_m if max_tile_m is None else max_tile_m)


# ----------------------------------- main --------------------------------------
if __name__ == "__main__":
    key = jax.random.PRNGKey(0)
    kx, kp = jax.random.split(key)

    # module: Conv2d(in=4, out=8, k=3, stride=1, padding=1), then shrink active slice
    conv = DynamicConv2dPallas(in_channels=4, out_channels=8, kernel_size=3,
                               stride=1, padding=1, bias=True, key=kp)
    conv.active_in_channels = 4     # must match input channels
    conv.active_out_channels = 6    # exercise the dynamic weight/bias slicing

    x = jax.random.normal(kx, (2, 4, 16, 16), jnp.float32)            # NCHW

    # reference: XLA conv on the sliced weight/bias, full f32
    ref = jax.lax.conv_general_dilated(
        x, conv.active_weight, window_strides=conv.stride,
        padding=[(conv.padding[0], conv.padding[0]),
                 (conv.padding[1], conv.padding[1])],
        dimension_numbers=("NCHW", "OIHW", "NCHW"))
    ref = ref + conv.active_bias[None, :, None, None]

    # 1) default tiling (single OH tile per batch element)
    y = jax.block_until_ready(conv(x))
    assert y.shape == (2, 6, 16, 16), y.shape
    max_err = float(jnp.max(jnp.abs(y - ref)))
    assert jnp.allclose(y, ref, atol=3e-2, rtol=3e-2), max_err

    # 2) force the multi-tile OH path (grid = (N, 2)) to validate tiled row offsets
    y2 = jax.block_until_ready(conv(x, max_tile_m=128))
    assert y2.shape == (2, 6, 16, 16), y2.shape
    max_err2 = float(jnp.max(jnp.abs(y2 - ref)))
    assert jnp.allclose(y2, ref, atol=3e-2, rtol=3e-2), max_err2

    print("KERNEL_OK")
</pallas_src>

<mosaic_0001>
module attributes {stable_mosaic.version = 11 : i64} {
  func.func @_conv_kernel(%arg0: i32, %arg1: i32, %arg2: memref<1x18x18x4xbf16, #tpu.memory_space<vmem>>, %arg3: memref<6x36xbf16, #tpu.memory_space<vmem>>, %arg4: memref<6x1xf32, #tpu.memory_space<vmem>>, %arg5: memref<1x6x256xf32, #tpu.memory_space<vmem>>) attributes {dimension_semantics = [#tpu.dimension_semantics<parallel>, #tpu.dimension_semantics<parallel>], iteration_bounds = array<i64: 2, 1>, scalar_prefetch = 0 : i64, scratch_operands = 0 : i64, tpu.core_type = #tpu.core_type<tc>, window_params = [{transform_indices = @transform_0, window_bounds = array<i64: 1, 18, 18, 4>}, {pipeline_mode = #tpu.pipeline_mode<synchronous>, transform_indices = @transform_1, window_bounds = array<i64: 6, 36>}, {pipeline_mode = #tpu.pipeline_mode<synchronous>, transform_indices = @transform_2, window_bounds = array<i64: 6, 1>}, {transform_indices = @transform_3, window_bounds = array<i64: 1, 6, 256>}]} {
    %c16_i32 = arith.constant 16 : i32
    %0 = arith.muli %arg1, %c16_i32 : i32
    %1 = tpu.assume_multiple %0, 8 : i32
    %c0_i32 = arith.constant 0 : i32
    %2 = arith.addi %1, %c0_i32 : i32
    %c0 = arith.constant 0 : index
    %3 = arith.index_cast %2 : i32 to index
    %c0_0 = arith.constant 0 : index
    %c0_1 = arith.constant 0 : index
    %4 = vector.load %arg2[%c0, %3, %c0_0, %c0_1] : memref<1x18x18x4xbf16, #tpu.memory_space<vmem>>, vector<1x16x16x4xbf16>
    %5 = vector.shape_cast %4 : vector<1x16x16x4xbf16> to vector<16x16x4xbf16>
    %c0_i32_2 = arith.constant 0 : i32
    %6 = arith.addi %1, %c0_i32_2 : i32
    %c0_3 = arith.constant 0 : index
    %7 = arith.index_cast %6 : i32 to index
    %c1 = arith.constant 1 : index
    %c0_4 = arith.constant 0 : index
    %8 = vector.load %arg2[%c0_3, %7, %c1, %c0_4] : memref<1x18x18x4xbf16, #tpu.memory_space<vmem>>, vector<1x16x16x4xbf16>
    %9 = vector.shape_cast %8 : vector<1x16x16x4xbf16> to vector<16x16x4xbf16>
    %c0_i32_5 = arith.constant 0 : i32
    %10 = arith.addi %1, %c0_i32_5 : i32
    %c0_6 = arith.constant 0 : index
    %11 = arith.index_cast %10 : i32 to index
    %c2 = arith.constant 2 : index
    %c0_7 = arith.constant 0 : index
    %12 = vector.load %arg2[%c0_6, %11, %c2, %c0_7] : memref<1x18x18x4xbf16, #tpu.memory_space<vmem>>, vector<1x16x16x4xbf16>
    %13 = vector.shape_cast %12 : vector<1x16x16x4xbf16> to vector<16x16x4xbf16>
    %c1_i32 = arith.constant 1 : i32
    %14 = arith.addi %1, %c1_i32 : i32
    %c0_8 = arith.constant 0 : index
    %15 = arith.index_cast %14 : i32 to index
    %c0_9 = arith.constant 0 : index
    %c0_10 = arith.constant 0 : index
    %16 = vector.load %arg2[%c0_8, %15, %c0_9, %c0_10] : memref<1x18x18x4xbf16, #tpu.memory_space<vmem>>, vector<1x16x16x4xbf16>
    %17 = vector.shape_cast %16 : vector<1x16x16x4xbf16> to vector<16x16x4xbf16>
    %c1_i32_11 = arith.constant 1 : i32
    %18 = arith.addi %1, %c1_i32_11 : i32
    %c0_12 = arith.constant 0 : index
    %19 = arith.index_cast %18 : i32 to index
    %c1_13 = arith.constant 1 : index
    %c0_14 = arith.constant 0 : index
    %20 = vector.load %arg2[%c0_12, %19, %c1_13, %c0_14] : memref<1x18x18x4xbf16, #tpu.memory_space<vmem>>, vector<1x16x16x4xbf16>
    %21 = vector.shape_cast %20 : vector<1x16x16x4xbf16> to vector<16x16x4xbf16>
    %c1_i32_15 = arith.constant 1 : i32
    %22 = arith.addi %1, %c1_i32_15 : i32
    %c0_16 = arith.constant 0 : index
    %23 = arith.index_cast %22 : i32 to index
    %c2_17 = arith.constant 2 : index
    %c0_18 = arith.constant 0 : index
    %24 = vector.load %arg2[%c0_16, %23, %c2_17, %c0_18] : memref<1x18x18x4xbf16, #tpu.memory_space<vmem>>, vector<1x16x16x4xbf16>
    %25 = vector.shape_cast %24 : vector<1x16x16x4xbf16> to vector<16x16x4xbf16>
    %c2_i32 = arith.constant 2 : i32
    %26 = arith.addi %1, %c2_i32 : i32
    %c0_19 = arith.constant 0 : index
    %27 = arith.index_cast %26 : i32 to index
    %c0_20 = arith.constant 0 : index
    %c0_21 = arith.constant 0 : index
    %28 = vector.load %arg2[%c0_19, %27, %c0_20, %c0_21] : memref<1x18x18x4xbf16, #tpu.memory_space<vmem>>, vector<1x16x16x4xbf16>
    %29 = vector.shape_cast %28 : vector<1x16x16x4xbf16> to vector<16x16x4xbf16>
    %c2_i32_22 = arith.constant 2 : i32
    %30 = arith.addi %1, %c2_i32_22 : i32
    %c0_23 = arith.constant 0 : index
    %31 = arith.index_cast %30 : i32 to index
    %c1_24 = arith.constant 1 : index
    %c0_25 = arith.constant 0 : index
    %32 = vector.load %arg2[%c0_23, %31, %c1_24, %c0_25] : memref<1x18x18x4xbf16, #tpu.memory_space<vmem>>, vector<1x16x16x4xbf16>
    %33 = vector.shape_cast %32 : vector<1x16x16x4xbf16> to vector<16x16x4xbf16>
    %c2_i32_26 = arith.constant 2 : i32
    %34 = arith.addi %1, %c2_i32_26 : i32
    %c0_27 = arith.constant 0 : index
    %35 = arith.index_cast %34 : i32 to index
    %c2_28 = arith.constant 2 : index
    %c0_29 = arith.constant 0 : index
    %36 = vector.load %arg2[%c0_27, %35, %c2_28, %c0_29] : memref<1x18x18x4xbf16, #tpu.memory_space<vmem>>, vector<1x16x16x4xbf16>
    %37 = vector.shape_cast %36 : vector<1x16x16x4xbf16> to vector<16x16x4xbf16>
    %38 = tpu.concatenate %5, %9, %13, %17, %21, %25, %29, %33, %37 in 2 : vector<16x16x4xbf16>, vector<16x16x4xbf16>, vector<16x16x4xbf16>, vector<16x16x4xbf16>, vector<16x16x4xbf16>, vector<16x16x4xbf16>, vector<16x16x4xbf16>, vector<16x16x4xbf16>, vector<16x16x4xbf16> -> vector<16x16x36xbf16>
    %39 = vector.shape_cast %38 : vector<16x16x36xbf16> to vector<256x36xbf16>
    %c0_30 = arith.constant 0 : index
    %c0_31 = arith.constant 0 : index
    %40 = vector.load %arg3[%c0_30, %c0_31] : memref<6x36xbf16, #tpu.memory_space<vmem>>, vector<6x36xbf16>
    %cst = arith.constant dense<0.000000e+00> : vector<6x256xf32>
    %41 = tpu.matmul %40, %39, %cst {dimension_numbers = #tpu.dot_dimension_numbers<[1], [1], [0], [0], [0, 0, 1, 0], [], []>} : vector<6x36xbf16>, vector<256x36xbf16>, vector<6x256xf32> -> vector<6x256xf32>
    %c0_32 = arith.constant 0 : index
    %c0_33 = arith.constant 0 : index
    %42 = vector.load %arg4[%c0_32, %c0_33] : memref<6x1xf32, #tpu.memory_space<vmem>>, vector<6x1xf32>
    %43 = vector.broadcast %42 : vector<6x1xf32> to vector<6x256xf32>
    %44 = arith.addf %41, %43 : vector<6x256xf32>
    %c0_34 = arith.constant 0 : index
    %c0_35 = arith.constant 0 : index
    %c0_36 = arith.constant 0 : index
    %45 = vector.load %arg5[%c0_34, %c0_35, %c0_36] : memref<1x6x256xf32, #tpu.memory_space<vmem>>, vector<1x6x256xf32>
    %46 = vector.shape_cast %45 : vector<1x6x256xf32> to vector<6x256xf32>
    %47 = vector.shape_cast %44 : vector<6x256xf32> to vector<1x6x256xf32>
    tpu.vector_store %arg5[%c0_34, %c0_35, %c0_36], %47 {strides = array<i32>} : memref<1x6x256xf32, #tpu.memory_space<vmem>>, vector<1x6x256xf32>,
    return
  }
  func.func @transform_0(%arg0: i32, %arg1: i32) -> (i32, i32, i32, i32) {
    %c0_i32 = arith.constant 0 : i32
    %c0_i32_0 = arith.constant 0 : i32
    %c0_i32_1 = arith.constant 0 : i32
    %c0_i32_2 = arith.constant 0 : i32
    return %arg0, %c0_i32, %c0_i32_0, %c0_i32_1 : i32, i32, i32, i32
  }
  func.func @transform_1(%arg0: i32, %arg1: i32) -> (i32, i32) {
    %c0_i32 = arith.constant 0 : i32
    %c0_i32_0 = arith.constant 0 : i32
    %c0_i32_1 = arith.constant 0 : i32
    return %c0_i32, %c0_i32_0 : i32, i32
  }
  func.func @transform_2(%arg0: i32, %arg1: i32) -> (i32, i32) {
    %c0_i32 = arith.constant 0 : i32
    %c0_i32_0 = arith.constant 0 : i32
    %c0_i32_1 = arith.constant 0 : i32
    return %c0_i32, %c0_i32_0 : i32, i32
  }
  func.func @transform_3(%arg0: i32, %arg1: i32) -> (i32, i32, i32) {
    %c0_i32 = arith.constant 0 : i32
    %c0_i32_0 = arith.constant 0 : i32
    return %arg0, %c0_i32, %arg1 : i32, i32, i32
  }
}

</mosaic_0001>

<bundles_post_ra>
// kernel: _dynamic_conv2d_forward.1
= control target key start
LH: loop header
LB: loop body
LE: loop exit
PB: predicated region body
PF: predicated region fallthrough
CT: control target
= control target key end

     0   :  { %s2888_s12 = smov 0   ;;  %s2890_s13 = smov 0   ;;  %s3909_s0 = inlined_call_operand.vmem [shape: bf16[2,18,18,4], index: 0, kind: input, shape index: {}]   ;;  %s3910_s1 = inlined_call_operand.vmem [shape: bf16[6,36], index: 1, kind: input, shape index: {}]   ;;  %s3911_s2 = inlined_call_operand.vmem [shape: f32[6,1], index: 2, kind: input, shape index: {}]   ;;  %s3912_s3 = inlined_call_operand.vmem [shape: f32[2,6,256], index: 3, kind: output, shape index: {}]  }
   0x1   :  { %s2892_s14 = smov 0  }
   0x2 LB: > { %s25_s15 = sadd.s32 1, %s2853_s13  ;;  %p2350_p0 = scmp.ge.s32.totalorder %s2857_s14, 1  ;;  %s2857_s14 = sphi %s2892_s14, %s13_s14   ;;  %s2853_s13 = sphi %s2890_s13, %s3914_s13   ;;  %s2849_s12 = sphi %s2888_s12, %s3913_s12  }
   0x3   : > { %p27_p1 = scmp.ge.s32.totalorder %s25_s15, 2  ;;  %p151_p2 = scmp.lt.s32.totalorder %s2857_s14, 3 }
   0x5   : > { %s3916_s15 = smov (%p27_p1, %s25_s15), 0  ;;  %p152_p3 = pnand %p2350_p0, %p151_p2 }
   0x6   : > { %p179_p4 = scmp.lt.s32.totalorder (!%p152_p3), %s2849_s12, 1  ;;  %s2859_s20 = smov (!%p152_p3), 12  }
   0x7   : > { %155 = sbr.rel (%p152_p3) target bundleno = 597 (0x255), region = 32  ;;  %s2860_s21 = smov (!%p152_p3), 20  }
   0x8   : > { %s2861_s22 = smov (!%p152_p3), 8   ;;  %s2862_s23 = smov (!%p152_p3), 4  }
   0x9   : > { %s2863_s24 = smov (!%p152_p3), 16   ;;  %s2864_s25 = smov (!%p152_p3), 24  }
   0xa   : > { %s2865_s26 = smov (!%p152_p3), 28   ;;  %s2866_s27 = smov (!%p152_p3), 32  }
   0xc   : > { %s3918_s12 = smov (!%p179_p4, %s2849_s12), 1  ;;  %vm800_vm0 = vcmask 1046528   ;;  %vm527_vm1 = vsmask.f32 7424  ;;  %vm1905_vm2 = vcmask 31744   ;;  %vm1938_vm3 = vcmask 64512  }
   0xd   : > { %s2656_s16 = smul.u32 216, %s3918_s12  ;;  %vm1971_vm4 = vcmask 97280   ;;  %vm2004_vm5 = vcmask 130048   ;;  %vm2037_vm6 = vcmask 162816   ;;  %vm2070_vm7 = vcmask 195584   ;;  %s2629_s5 = sshll.u32 %s3918_s12, 4 }
   0xe   : > { %vm2103_vm8 = vcmask 228352   ;;  %vm2136_vm9 = vcmask 261120   ;;  %vm2176_vm10 = vcmask 293888   ;;  %s192_s8 = scalar_lea.vmem %s3912_s3, %s2629_s5 }
   0xf   : > { %s2912_s19 = scalar_lea.vmem %s3909_s0, %s2656_s16 }
  0x10   : > { %v2384_v0 = vld [vmem:[%s2912_s19 + $0xc0] sm:$0xf]  ;;  %v2385_v1 = vld [vmem:[%s2912_s19 + $0xc4] sm:$0xf]  ;;  %v214_v12 = vld [vmem:[%s2912_s19 + $0x58] sm:$0xf] }
  0x11   : > { %v2417_v2 = vld [vmem:[%s2912_s19 + $0xc0] sm:$0xe]  ;;  %v2917_v3 = vcombine.low %v2384_v0, %v2385_v1  ;;  %v2369_v6 = vld [vmem:[%s2912_s19 + $0x64] sm:$0xf]  ;;  %v254_v16 = vld [vmem:[%s2912_s19 + $0x54] sm:$0xe] }
  0x12   : > { %v2577_v4 = vcombine.low %v2417_v2, %v2385_v1  ;;  %v2368_v5 = vld [vmem:[%s2912_s19 + $0x60] sm:$0xf]  ;;  %v2925_v10 = vld [vmem:[%s2912_s19 + $0x68] ss:$0 sps:$4 sm:$0x11]   ;;  %v2521_v19 = vcombine.low %v254_v16, %v214_v12 }
  0x13   : > { %v2409_v7 = vld [vmem:[%s2912_s19 + $0x60] sm:$0xe]  ;;  %v2922_v8 = vcombine.low %v2368_v5, %v2369_v6  ;;  %991 = vrot.lane.b32.xlu1 %v2917_v3, %s2859_s20  ;;  %v1224_v11 = vshll.u32 %v2917_v3, 16  ;;  %v1335_v15 = vrot.slane %v2925_v10, 1  ;;  %v213_v20 = vld [vmem:[%s2912_s19 + $0x54] sm:$0xf] }
  0x14   : > { %v2569_v9 = vcombine.low %v2409_v7, %v2369_v6  ;;  %v1358_v17 = vrot.slane %v2577_v4, 1  ;;  %v2696_v18 = vld [vmem:[%s2912_s19 + $0x5c] ss:$0 sps:$4 sm:$0x11]   ;;  %v1222_v21 = vshrl.u32 %v2917_v3, 16  ;;  %v2940_v23 = vcombine.low %v213_v20, %v214_v12 }
  0x15   : > { %975 = vrot.lane.b32.xlu0 %v2922_v8, %s2859_s20  ;;  %v1128_v13 = vshll.u32 %v2922_v8, 16  ;;  %v229_v24 = vld [vmem:[%s2912_s19 + $0xb4] sm:$0xf]  ;;  %v230_v25 = vld [vmem:[%s2912_s19 + $0xb8] sm:$0xf]  ;;  %v822_v26 = vrot.slane %v2521_v19, 1 }
  0x16   : > { %v1334_v14 = vrot.slane %v2569_v9, 1  ;;  %v823_v27 = vrot.slane %v2696_v18, 1  ;;  %v262_v28 = vld [vmem:[%s2912_s19 + $0xb4] sm:$0xe]  ;;  %v2945_v29 = vcombine.low %v229_v24, %v230_v25  ;;  %v620_v30 = vshll.u32 %v2696_v18, 16 }
  0x17   : > { %v2700_v31 = vld [vmem:[%s2912_s19 + $0xbc] ss:$0 sps:$4 sm:$0x11]   ;;  %v2529_v32 = vcombine.low %v262_v28, %v230_v25  ;;  %v613_v33 = vshrl.u32 %v2940_v23, 16  ;;  %v615_v34 = vshll.u32 %v2940_v23, 16  ;;  %v1226_v35 = vrot.slane %v1224_v11, 1 }
  0x18   : > { %v1336_v22 = vsel %vm800_vm0, %v1334_v14, %v1335_v15  ;;  %v824_v36 = vsel %vm800_vm0, %v822_v26, %v823_v27  ;;  %v622_v37 = vrot.slane %v620_v30, 1  ;;  %v2702_v38 = vld [vmem:[%s2912_s19 + $0xc8] ss:$0 sps:$4 sm:$0x11]   ;;  %v847_v40 = vrot.slane %v2700_v31, 1 }
  0x19   : > { %1375 = vrot.lane.b32.xlu0 %v1336_v22, %s2860_s21  ;;  %863 = vrot.lane.b32.xlu1 %v824_v36, %s2861_s22  ;;  %v846_v39 = vrot.slane %v2529_v32, 1  ;;  %v617_v41 = vrot.slane %v615_v34, 1  ;;  %v709_v42 = vshrl.u32 %v2945_v29, 16  ;;  %v2448_v43 = vld [vmem:[%s2912_s19 + $0xcc] sm:$0xf]  ;;  %v1359_v44 = vrot.slane %v2702_v38, 1 }
  0x1a   : > { %v711_v45 = vshll.u32 %v2945_v29, 16  ;;  %v716_v46 = vshll.u32 %v2700_v31, 16  ;;  %v1229_v47 = vshll.u32 %v2702_v38, 16  ;;  %v2449_v48 = vld [vmem:[%s2912_s19 + $0xd0] sm:$0xf]  ;;  %v1126_v51 = vshrl.u32 %v2922_v8, 16 }
  0x1b   : > { %v848_v49 = vsel %vm800_vm0, %v846_v39, %v847_v40  ;;  %v618_v50 = vor.u32 %v617_v41, %v613_v33  ;;  %v1130_v52 = vrot.slane %v1128_v13, 1  ;;  %v2432_v53 = vld [vmem:[%s2912_s19 + $0x6c] sm:$0xf]  ;;  %v1227_v56 = vor.u32 %v1226_v35, %v1222_v21  ;;  %v2433_v57 = vld [vmem:[%s2912_s19 + $0x70] sm:$0xf] }
  0x1c   : > { %v713_v54 = vrot.slane %v711_v45, 1  ;;  %v718_v55 = vrot.slane %v716_v46, 1  ;;  %v1231_v59 = vrot.slane %v1229_v47, 1  ;;  %v1133_v60 = vshll.u32 %v2925_v10, 16  ;;  %v227_v8 = vld [vmem:[%s2912_s19 + $0xa8] sm:$0xf] }
  0x1d   : > { %879 = vrot.lane.b32.xlu1 %v848_v49, %s2861_s22  ;;  %v623_v58 = vsel %vm527_vm1, %v618_v50, %v622_v37  ;;  %v2593_v61 = vcombine.low %v2448_v43, %v2449_v48  ;;  %v1360_v62 = vsel %vm800_vm0, %v1358_v17, %v1359_v44  ;;  %v2585_v0 = vcombine.low %v2432_v53, %v2433_v57  ;;  %v2968_v1 = vld [vmem:[%s2912_s19 + $0xd4] ss:$0 sps:$4 sm:$0x11]   ;;  %v2481_v10 = vld [vmem:[%s2912_s19 + $0xcc] sm:$0xe] }
  0x1e   : > { %734 = vrot.lane.b32.xlu0 %v623_v58, %s2862_s23  ;;  %v714_v63 = vor.u32 %v713_v54, %v709_v42  ;;  %v1131_v2 = vor.u32 %v1130_v52, %v1126_v51  ;;  %v1135_v3 = vrot.slane %v1133_v60, 1  ;;  %v2708_v5 = vld [vmem:[%s2912_s19 + $0x74] ss:$0 sps:$4 sm:$0x11]   ;;  %v1232_v9 = vsel %vm527_vm1, %v1227_v56, %v1231_v59  ;;  %v2473_v11 = vld [vmem:[%s2912_s19 + $0x6c] sm:$0xe] }
  0x1f   : > { %v1736_v4 = vshll.u32 %v2593_v61, 16  ;;  %v1640_v7 = vshll.u32 %v2585_v0, 16  ;;  %v2978_v12 = vld [vmem:[%s2912_s19 + $0xac] sm:$0xf]  ;;  %v1734_v13 = vshrl.u32 %v2593_v61, 16  ;;  %v1741_v15 = vshll.u32 %v2968_v1, 16 }
  0x20   : > { %v719_v6 = vsel %vm527_vm1, %v714_v63, %v718_v55  ;;  %v1638_v16 = vshrl.u32 %v2585_v0, 16  ;;  %v1136_v17 = vsel %vm527_vm1, %v1131_v2, %v1135_v3  ;;  %v1645_v19 = vshll.u32 %v2708_v5, 16  ;;  %v211_v22 = vld [vmem:[%s2912_s19 + $0x48] sm:$0xf]  ;;  %v212_v24 = vld [vmem:[%s2912_s19 + $0x4c] sm:$0xf] }
  0x21   : > { %1391 = vrot.lane.b32.xlu1 %v1360_v62, %s2860_s21  ;;  %v1738_v14 = vrot.slane %v1736_v4, 1  ;;  %v1642_v18 = vrot.slane %v1640_v7, 1  ;;  %v2984_v20 = vcombine.low %v227_v8, %v2978_v12  ;;  %v2625_v21 = vcombine.low %v2481_v10, %v2449_v48  ;;  %v2990_v26 = vld [vmem:[%s2912_s19 + $0xb0] ss:$0 sps:$4 sm:$0x11]  }
  0x22   : > { %750 = vrot.lane.b32.xlu0 %v719_v6, %s2862_s23  ;;  %v2617_v25 = vcombine.low %v2473_v11, %v2433_v57  ;;  %v1743_v28 = vrot.slane %v1741_v15, 1  ;;  %v2994_v31 = vcombine.low %v211_v22, %v212_v24  ;;  %v2997_v32 = vld [vmem:[%s2912_s19 + $0x50] ss:$0 sps:$4 sm:$0x11]   ;;  %v1647_v34 = vrot.slane %v1645_v19, 1 }
  0x23   : > { %v1739_v27 = vor.u32 %v1738_v14, %v1734_v13  ;;  %v699_v30 = vshll.u32 %v2984_v20, 16  ;;  %v1643_v33 = vor.u32 %v1642_v18, %v1638_v16  ;;  %v1870_v35 = vrot.slane %v2625_v21, 1  ;;  %v261_v42 = vld [vmem:[%s2912_s19 + $0xa8] sm:$0xe]  ;;  %v2382_v47 = vld [vmem:[%s2912_s19 + $0xb4] sm:$0xf] }
  0x24   : > { %v1871_v36 = vrot.slane %v2968_v1, 1  ;;  %v603_v37 = vshll.u32 %v2994_v31, 16  ;;  %v1846_v38 = vrot.slane %v2617_v25, 1  ;;  %v1847_v39 = vrot.slane %v2708_v5, 1  ;;  %v253_v46 = vld [vmem:[%s2912_s19 + $0x48] sm:$0xe] }
  0x25   : > { %1263 = vrot.lane.b32.xlu1 %v1232_v9, %s2863_s24  ;;  %v697_v40 = vshrl.u32 %v2984_v20, 16  ;;  %v704_v41 = vshll.u32 %v2990_v26, 16  ;;  %v1744_v43 = vsel %vm527_vm1, %v1739_v27, %v1743_v28  ;;  %v701_v44 = vrot.slane %v699_v30, 1  ;;  %v2383_v51 = vld [vmem:[%s2912_s19 + $0xb8] sm:$0xf] }
  0x26   : > { %1247 = vrot.lane.b32.xlu0 %v1136_v17, %s2863_s24  ;;  %v608_v45 = vshll.u32 %v2997_v32, 16  ;;  %v1648_v48 = vsel %vm527_vm1, %v1643_v33, %v1647_v34  ;;  %v601_v49 = vshrl.u32 %v2994_v31, 16  ;;  %v605_v50 = vrot.slane %v603_v37, 1  ;;  %v2366_v52 = vld [vmem:[%s2912_s19 + $0x54] sm:$0xf] }
  0x27   : > { %v2367_v53 = vld [vmem:[%s2912_s19 + $0x58] sm:$0xf]  ;;  %v1872_v54 = vsel %vm800_vm0, %v1870_v35, %v1871_v36  ;;  %v1848_v55 = vsel %vm800_vm0, %v1846_v38, %v1847_v39  ;;  %v702_v56 = vor.u32 %v701_v44, %v697_v40  ;;  %v706_v57 = vrot.slane %v704_v41, 1  ;;  %v2720_v9 = vld [vmem:[%s2912_s19 + $0x5c] ss:$0 sps:$4 sm:$0x11]  }
  0x28   : > { %v2528_v58 = vcombine.low %v261_v42, %v2978_v12  ;;  %v2544_v59 = vcombine.low %v2382_v47, %v2383_v51  ;;  %v606_v60 = vor.u32 %v605_v50, %v601_v49  ;;  %v2520_v62 = vcombine.low %v253_v46, %v212_v24  ;;  %v2416_v10 = vld [vmem:[%s2912_s19 + $0xb4] sm:$0xe]  ;;  %v2446_v14 = vld [vmem:[%s2912_s19 + $0xc0] sm:$0xf]  ;;  %v2447_v18 = vld [vmem:[%s2912_s19 + $0xc4] sm:$0xf] }
  0x29   : > { %1503 = vrot.lane.b32.xlu1 %v2593_v61, %s2864_s25  ;;  %v610_v61 = vrot.slane %v608_v45, 1  ;;  %v2536_v63 = vcombine.low %v2366_v52, %v2367_v53  ;;  %v707_v1 = vsel %vm527_vm1, %v702_v56, %v706_v57  ;;  %v844_v3 = vrot.slane %v2990_v26, 1  ;;  %v2408_v11 = vld [vmem:[%s2912_s19 + $0x54] sm:$0xe]  ;;  %v2430_v24 = vld [vmem:[%s2912_s19 + $0x60] sm:$0xf] }
  0x2a   : > { %1487 = vrot.lane.b32.xlu0 %v2585_v0, %s2864_s25  ;;  %v2719_v0 = vld [vmem:[%s2912_s19 + $0xbc] ss:$0 sps:$4 sm:$0x11]   ;;  %v843_v2 = vrot.slane %v2528_v58, 1  ;;  %v1212_v4 = vshll.u32 %v2544_v59, 16  ;;  %v819_v6 = vrot.slane %v2520_v62, 1  ;;  %v2576_v26 = vcombine.low %v2416_v10, %v2383_v51 }
  0x2b   : > { %v611_v5 = vsel %vm527_vm1, %v606_v60, %v610_v61  ;;  %v820_v7 = vrot.slane %v2997_v32, 1  ;;  %v1116_v8 = vshll.u32 %v2536_v63, 16  ;;  %v1210_v12 = vshrl.u32 %v2544_v59, 16  ;;  %v2431_v25 = vld [vmem:[%s2912_s19 + $0x64] sm:$0xf] }
  0x2c   : > { %v1217_v13 = vshll.u32 %v2719_v0, 16  ;;  %v845_v15 = vsel %vm800_vm0, %v843_v2, %v844_v3  ;;  %v1214_v16 = vrot.slane %v1212_v4, 1  ;;  %v1114_v17 = vshrl.u32 %v2536_v63, 16  ;;  %v2725_v41 = vld [vmem:[%s2912_s19 + $0xc8] ss:$0 sps:$4 sm:$0x11]  }
  0x2d   : > { %1775 = vrot.lane.b32.xlu1 %v1744_v43, %s2865_s26  ;;  %v821_v19 = vsel %vm800_vm0, %v819_v6, %v820_v7  ;;  %v1118_v21 = vrot.slane %v1116_v8, 1  ;;  %v1121_v22 = vshll.u32 %v2720_v9, 16  ;;  %v2568_v27 = vcombine.low %v2408_v11, %v2367_v53  ;;  %v2726_v44 = vld [vmem:[%s2912_s19 + $0x68] ss:$0 sps:$4 sm:$0x11]  }
  0x2e   : > { %1759 = vrot.lane.b32.xlu0 %v1648_v48, %s2865_s26  ;;  %v2592_v28 = vcombine.low %v2446_v14, %v2447_v18  ;;  %v1215_v30 = vor.u32 %v1214_v16, %v1210_v12  ;;  %v1219_v32 = vrot.slane %v1217_v13, 1  ;;  %v2584_v33 = vcombine.low %v2430_v24, %v2431_v25  ;;  %v225_v46 = vld [vmem:[%s2912_s19 + $0x9c] sm:$0xf]  ;;  %v226_v47 = vld [vmem:[%s2912_s19 + $0xa0] sm:$0xf] }
  0x2f   : > { %v1119_v34 = vor.u32 %v1118_v21, %v1114_v17  ;;  %v1123_v35 = vrot.slane %v1121_v22, 1  ;;  %v1355_v36 = vrot.slane %v2576_v26, 1  ;;  %v1356_v37 = vrot.slane %v2719_v0, 1  ;;  %v209_v48 = vld [vmem:[%s2912_s19 + $0x3c] sm:$0xf] }
  0x30   : > { %v1331_v38 = vrot.slane %v2568_v27, 1  ;;  %v1332_v39 = vrot.slane %v2720_v9, 1  ;;  %v1724_v40 = vshll.u32 %v2592_v28, 16  ;;  %v1220_v42 = vsel %vm527_vm1, %v1215_v30, %v1219_v32  ;;  %v3050_v49 = vld [vmem:[%s2912_s19 + $0x40] sm:$0xf] }
  0x31   : > { %1903 = vrot.lane.b32.xlu1 %v1872_v54, %s2866_s27  ;;  %v1628_v43 = vshll.u32 %v2584_v33, 16  ;;  %v1124_v45 = vsel %vm527_vm1, %v1119_v34, %v1123_v35  ;;  %v1357_v50 = vsel %vm800_vm0, %v1355_v36, %v1356_v37  ;;  %v2480_v52 = vld [vmem:[%s2912_s19 + $0xc0] sm:$0xe]  ;;  %v1722_v54 = vshrl.u32 %v2592_v28, 16  ;;  %v260_v17 = vld [vmem:[%s2912_s19 + $0x9c] sm:$0xe] }
  0x32   : > { %1887 = vrot.lane.b32.xlu0 %v1848_v55, %s2866_s27  ;;  %v1333_v51 = vsel %vm800_vm0, %v1331_v38, %v1332_v39  ;;  %v2472_v53 = vld [vmem:[%s2912_s19 + $0x60] sm:$0xe]  ;;  %v1726_v55 = vrot.slane %v1724_v40, 1  ;;  %v1729_v56 = vshll.u32 %v2725_v41, 16  ;;  %v3058_v57 = vcombine.low %v225_v46, %v226_v47  ;;  %v2381_v24 = vld [vmem:[%s2912_s19 + $0xac] sm:$0xf] }
  0x33   : > { %v1626_v58 = vshrl.u32 %v2584_v33, 16  ;;  %v1633_v60 = vshll.u32 %v2726_v44, 16  ;;  %v3061_v61 = vcombine.low %v209_v48, %v3050_v49  ;;  %v2624_v62 = vcombine.low %v2480_v52, %v2447_v18  ;;  %v2728_v0 = vld [vmem:[%s2912_s19 + $0xa4] ss:$0 sps:$4 sm:$0x11]  }
  0x34   : > { %v1731_v2 = vrot.slane %v1729_v56, 1  ;;  %v687_v3 = vshll.u32 %v3058_v57, 16  ;;  %v2730_v6 = vld [vmem:[%s2912_s19 + $0x44] ss:$0 sps:$4 sm:$0x11]   ;;  %v1868_v9 = vrot.slane %v2725_v41, 1  ;;  %v2527_v30 = vcombine.low %v260_v17, %v226_v47 }
  0x35   : > { %748 = vrot.lane.b32.xlu1 %v707_v1, %s2862_s23  ;;  %v1727_v1 = vor.u32 %v1726_v55, %v1722_v54  ;;  %v591_v7 = vshll.u32 %v3061_v61, 16  ;;  %v1867_v8 = vrot.slane %v2624_v62, 1  ;;  %v1844_v11 = vrot.slane %v2726_v44, 1  ;;  %v2380_v18 = vld [vmem:[%s2912_s19 + $0xa8] sm:$0xf] }
  0x36   : > { %732 = vrot.lane.b32.xlu0 %v611_v5, %s2862_s23  ;;  %v1635_v5 = vrot.slane %v1633_v60, 1  ;;  %v685_v12 = vshrl.u32 %v3058_v57, 16  ;;  %v692_v13 = vshll.u32 %v2728_v0, 16  ;;  %v589_v16 = vshrl.u32 %v3061_v61, 16  ;;  %v2364_v26 = vld [vmem:[%s2912_s19 + $0x48] sm:$0xf] }
  0x37   : > { %v1732_v14 = vsel %vm527_vm1, %v1727_v1, %v1731_v2  ;;  %v593_v21 = vrot.slane %v591_v7, 1  ;;  %v596_v22 = vshll.u32 %v2730_v6, 16  ;;  %v2365_v27 = vld [vmem:[%s2912_s19 + $0x4c] sm:$0xf]  ;;  %v2543_v35 = vcombine.low %v2380_v18, %v2381_v24  ;;  %v2407_v52 = vld [vmem:[%s2912_s19 + $0x48] sm:$0xe] }
  0x38   : > { %v694_v34 = vrot.slane %v692_v13, 1  ;;  %v2535_v39 = vcombine.low %v2364_v26, %v2365_v27  ;;  %v840_v40 = vrot.slane %v2527_v30, 1  ;;  %v841_v41 = vrot.slane %v2728_v0, 1  ;;  %v2737_v44 = vld [vmem:[%s2912_s19 + $0xb0] ss:$0 sps:$4 sm:$0x11]  }
  0x39   : > { %877 = vrot.lane.b32.xlu1 %v845_v15, %s2861_s22  ;;  %v689_v15 = vrot.slane %v687_v3, 1  ;;  %v594_v36 = vor.u32 %v593_v21, %v589_v16  ;;  %v598_v37 = vrot.slane %v596_v22, 1  ;;  %v817_v47 = vrot.slane %v2730_v6, 1  ;;  %v3098_v54 = vld [vmem:[%s2912_s19 + $0xb8] sm:$0xf] }
  0x3a   : > { %861 = vrot.lane.b32.xlu0 %v821_v19, %s2861_s22  ;;  %v1104_v48 = vshll.u32 %v2535_v39, 16  ;;  %v1198_v55 = vshrl.u32 %v2543_v35, 16  ;;  %v2428_v0 = vld [vmem:[%s2912_s19 + $0x54] sm:$0xf]  ;;  %v2429_v1 = vld [vmem:[%s2912_s19 + $0x58] sm:$0xf]  ;;  %v2567_v3 = vcombine.low %v2407_v52, %v2365_v27 }
  0x3b   : > { %v2583_v7 = vcombine.low %v2428_v0, %v2429_v1  ;;  %v224_v22 = vld [vmem:[%s2912_s19 + $0x94] sm:$0xf] }
  0x3c   : > { %v1106_v62 = vrot.slane %v1104_v48, 1  ;;  %v2479_v26 = vld [vmem:[%s2912_s19 + $0xb4] sm:$0xe] }
  0x3d   : > { %989 = vrot.lane.b32.xlu1 %v2544_v59, %s2859_s20  ;;  %v1630_v59 = vrot.slane %v1628_v43, 1  ;;  %v1200_v43 = vshll.u32 %v2543_v35, 16  ;;  %v1616_v18 = vshll.u32 %v2583_v7, 16  ;;  %v2471_v27 = vld [vmem:[%s2912_s19 + $0x54] sm:$0xe] }
  0x3e   : > { %973 = vrot.lane.b32.xlu0 %v2536_v63, %s2859_s20  ;;  %v2616_v63 = vcombine.low %v2472_v53, %v2431_v25  ;;  %v252_v25 = vld [vmem:[%s2912_s19 + $0x3c] sm:$0xe]  ;;  %v2444_v53 = vld [vmem:[%s2912_s19 + $0xb4] sm:$0xf] }
  0x3f   : > { %v1631_v4 = vor.u32 %v1630_v59, %v1626_v58  ;;  %v2519_v38 = vcombine.low %v252_v25, %v3050_v49  ;;  %v2738_v49 = vld [vmem:[%s2912_s19 + $0x50] ss:$0 sps:$4 sm:$0x11]   ;;  %v1202_v56 = vrot.slane %v1200_v43, 1  ;;  %v1205_v58 = vshll.u32 %v2737_v44, 16 }
  0x40   : > { %v1843_v10 = vrot.slane %v2616_v63, 1  ;;  %v1102_v59 = vshrl.u32 %v2535_v39, 16  ;;  %v1109_v63 = vshll.u32 %v2738_v49, 16  ;;  %v1329_v17 = vrot.slane %v2738_v49, 1  ;;  %v3121_v25 = vld [vmem:[%s2912_s19 + $0x34] sm:$0xf] }
  0x41   : > { %1261 = vrot.lane.b32.xlu1 %v1220_v42, %s2863_s24  ;;  %v1636_v19 = vsel %vm527_vm1, %v1631_v4, %v1635_v5  ;;  %v816_v46 = vrot.slane %v2519_v38, 1  ;;  %v2591_v4 = vcombine.low %v2444_v53, %v3098_v54  ;;  %v1203_v5 = vor.u32 %v1202_v56, %v1198_v55 }
  0x42   : > { %1245 = vrot.lane.b32.xlu0 %v1124_v45, %s2863_s24  ;;  %v1845_v32 = vsel %vm800_vm0, %v1843_v10, %v1844_v11  ;;  %v599_v45 = vsel %vm527_vm1, %v594_v36, %v598_v37  ;;  %v1207_v6 = vrot.slane %v1205_v58, 1  ;;  %v1353_v11 = vrot.slane %v2737_v44, 1  ;;  %v2746_v44 = vld [vmem:[%s2912_s19 + $0x98] ss:$0 sps:$4 sm:$0x11]  }
  0x43   : > { %v818_v60 = vsel %vm800_vm0, %v816_v46, %v817_v47  ;;  %v1712_v13 = vshll.u32 %v2591_v4, 16  ;;  %v1614_v37 = vshrl.u32 %v2583_v7, 16  ;;  %v1618_v38 = vrot.slane %v1616_v18, 1  ;;  %v2748_v46 = vld [vmem:[%s2912_s19 + $0x38] ss:$0 sps:$4 sm:$0x11]  }
  0x44   : > { %v1208_v16 = vsel %vm527_vm1, %v1203_v5, %v1207_v6  ;;  %v680_v56 = vshll.u32 %v2746_v44, 16  ;;  %v259_v58 = vld [vmem:[%s2912_s19 + $0x90] sm:$0xe]  ;;  %v584_v0 = vshll.u32 %v2748_v46, 16  ;;  %v2363_v5 = vld [vmem:[%s2912_s19 + $0x40] sm:$0xf] }
  0x45   : > { %1389 = vrot.lane.b32.xlu1 %v1357_v50, %s2860_s21  ;;  %v2415_v50 = vld [vmem:[%s2912_s19 + $0xa8] sm:$0xe]  ;;  %v1714_v30 = vrot.slane %v1712_v13, 1  ;;  %v1619_v48 = vor.u32 %v1618_v38, %v1614_v37  ;;  %v2526_v6 = vcombine.low %v259_v58, %v224_v22 }
  0x46   : > { %1373 = vrot.lane.b32.xlu0 %v1333_v51, %s2860_s21  ;;  %v842_v51 = vsel %vm800_vm0, %v840_v40, %v841_v41  ;;  %v2575_v2 = vcombine.low %v2415_v50, %v2381_v24  ;;  %v207_v24 = vld [vmem:[%s2912_s19 + $0x30] sm:$0xf]  ;;  %v2623_v40 = vcombine.low %v2479_v26, %v3098_v54  ;;  %v2615_v41 = vcombine.low %v2471_v27, %v2429_v1  ;;  %v2379_v1 = vld [vmem:[%s2912_s19 + $0xa0] sm:$0xf] }
  0x48   : > { %v1352_v10 = vrot.slane %v2575_v2, 1  ;;  %v1864_v50 = vrot.slane %v2623_v40, 1  ;;  %v1840_v52 = vrot.slane %v2615_v41, 1  ;;  %v2442_v41 = vld [vmem:[%s2912_s19 + $0xa8] sm:$0xf] }
  0x49   : > { %1501 = vrot.lane.b32.xlu1 %v2592_v28, %s2864_s25  ;;  %v1869_v28 = vsel %vm800_vm0, %v1867_v8, %v1868_v9  ;;  %v1107_v8 = vor.u32 %v1106_v62, %v1102_v59  ;;  %v1111_v9 = vrot.slane %v1109_v63, 1  ;;  %v2378_v59 = vld [vmem:[%s2912_s19 + $0x9c] sm:$0xf] }
  0x4a   : > { %1485 = vrot.lane.b32.xlu0 %v2584_v33, %s2864_s25  ;;  %v690_v33 = vor.u32 %v689_v15, %v685_v12  ;;  %v1328_v12 = vrot.slane %v2567_v3, 1  ;;  %v3112_v15 = vld [vmem:[%s2912_s19 + $0x5c] ss:$0 sps:$4 sm:$0x11]  }
  0x4b   : > { %v1112_v21 = vsel %vm527_vm1, %v1107_v8, %v1111_v9  ;;  %v1841_v53 = vrot.slane %v3112_v15, 1  ;;  %v2362_v3 = vld [vmem:[%s2912_s19 + $0x3c] sm:$0xf]  ;;  %v2542_v8 = vcombine.low %v2378_v59, %v2379_v1  ;;  %v3182_v59 = vld [vmem:[%s2912_s19 + $0xb0] ss:$0 sps:$4 sm:$0x11]  }
  0x4c   : > { %v695_v42 = vsel %vm527_vm1, %v690_v33, %v694_v34  ;;  %v1354_v33 = vsel %vm800_vm0, %v1352_v10, %v1353_v11  ;;  %v1330_v36 = vsel %vm800_vm0, %v1328_v12, %v1329_v17  ;;  %v682_v10 = vrot.slane %v680_v56, 1 }
  0x4d   : > { %1773 = vrot.lane.b32.xlu1 %v1732_v14, %s2865_s26  ;;  %v3109_v14 = vld [vmem:[%s2912_s19 + $0xbc] ss:$0 sps:$4 sm:$0x11]   ;;  %v2534_v11 = vcombine.low %v2362_v3, %v2363_v5  ;;  %v1842_v12 = vsel %vm800_vm0, %v1840_v52, %v1841_v53  ;;  %v838_v17 = vrot.slane %v2746_v44, 1  ;;  %v1188_v18 = vshll.u32 %v2542_v8, 16 }
  0x4e   : > { %1757 = vrot.lane.b32.xlu0 %v1636_v19, %s2865_s26  ;;  %v223_v19 = vld [vmem:[%s2912_s19 + $0x90] sm:$0xf]  ;;  %v2426_v44 = vld [vmem:[%s2912_s19 + $0x48] sm:$0xf] }
  0x4f   : > { %v3129_v34 = vcombine.low %v223_v19, %v224_v22  ;;  %v2755_v19 = vld [vmem:[%s2912_s19 + $0xa4] ss:$0 sps:$4 sm:$0x11]   ;;  %v1092_v22 = vshll.u32 %v2534_v11, 16  ;;  %v1190_v37 = vrot.slane %v1188_v18, 1 }
  0x50   : > { %v1193_v38 = vshll.u32 %v2755_v19, 16  ;;  %v3192_v3 = vld [vmem:[%s2912_s19 + $0x88] sm:$0xf] }
  0x51   : > { %1901 = vrot.lane.b32.xlu1 %v1869_v28, %s2866_s27  ;;  %v1710_v28 = vshrl.u32 %v2591_v4, 16  ;;  %v673_v55 = vshrl.u32 %v3129_v34, 16 }
  0x52   : > { %1885 = vrot.lane.b32.xlu0 %v1845_v32, %s2866_s27  ;;  %v1717_v32 = vshll.u32 %v3109_v14, 16 }
  0x54   : > { %v1719_v43 = vrot.slane %v1717_v32, 1  ;;  %v2406_v32 = vld [vmem:[%s2912_s19 + $0x3c] sm:$0xe] }
  0x55   : > { %746 = vrot.lane.b32.xlu1 %v695_v42, %s2862_s23  ;;  %v1715_v42 = vor.u32 %v1714_v30, %v1710_v28  ;;  %v2414_v30 = vld [vmem:[%s2912_s19 + $0x9c] sm:$0xe] }
  0x56   : > { %730 = vrot.lane.b32.xlu0 %v599_v45, %s2862_s23  ;;  %v675_v45 = vshll.u32 %v3129_v34, 16 }
  0x57   : > { %v1720_v54 = vsel %vm527_vm1, %v1715_v42, %v1719_v43  ;;  %v2443_v43 = vld [vmem:[%s2912_s19 + $0xac] sm:$0xf] }
  0x59   : > { %875 = vrot.lane.b32.xlu1 %v842_v51, %s2861_s22  ;;  %v1865_v51 = vrot.slane %v3109_v14, 1  ;;  %v586_v14 = vrot.slane %v584_v0, 1  ;;  %v3187_v0 = vld [vmem:[%s2912_s19 + $0x50] ss:$0 sps:$4 sm:$0x11]  }
  0x5a   : > { %859 = vrot.lane.b32.xlu0 %v818_v60, %s2861_s22  ;;  %v677_v60 = vrot.slane %v675_v45, 1  ;;  %v2427_v45 = vld [vmem:[%s2912_s19 + $0x4c] sm:$0xf] }
  0x5c   : > { %v678_v9 = vor.u32 %v677_v60, %v673_v55  ;;  %v1350_v55 = vrot.slane %v2755_v19, 1 }
  0x5d   : > { %987 = vrot.lane.b32.xlu1 %v2543_v35, %s2859_s20  ;;  %v3132_v35 = vcombine.low %v207_v24, %v3121_v25  ;;  %v2756_v24 = vld [vmem:[%s2912_s19 + $0x44] ss:$0 sps:$4 sm:$0x11]  }
  0x5e   : > { %971 = vrot.lane.b32.xlu0 %v2535_v39, %s2859_s20  ;;  %v1621_v39 = vshll.u32 %v3112_v15, 16  ;;  %v1097_v40 = vshll.u32 %v2756_v24, 16  ;;  %v1326_v58 = vrot.slane %v2756_v24, 1  ;;  %v3218_v24 = vld [vmem:[%s2912_s19 + $0x8c] ss:$0 sps:$4 sm:$0x11]  }
  0x5f   : > { %v579_v47 = vshll.u32 %v3132_v35, 16  ;;  %v577_v62 = vshrl.u32 %v3132_v35, 16 }
  0x60   : > { %v1623_v49 = vrot.slane %v1621_v39, 1  ;;  %v1094_v39 = vrot.slane %v1092_v22, 1  ;;  %v1099_v53 = vrot.slane %v1097_v40, 1 }
  0x61   : > { %1259 = vrot.lane.b32.xlu1 %v1208_v16, %s2863_s24  ;;  %v581_v63 = vrot.slane %v579_v47, 1  ;;  %v837_v16 = vrot.slane %v2526_v6, 1  ;;  %v2566_v47 = vcombine.low %v2406_v32, %v2363_v5  ;;  %v205_v5 = vld [vmem:[%s2912_s19 + $0x24] sm:$0xf] }
  0x62   : > { %1243 = vrot.lane.b32.xlu0 %v1112_v21, %s2863_s24  ;;  %v1624_v2 = vsel %vm527_vm1, %v1619_v48, %v1623_v49  ;;  %v683_v21 = vsel %vm527_vm1, %v678_v9, %v682_v10  ;;  %v1195_v49 = vrot.slane %v1193_v38, 1  ;;  %v2470_v9 = vld [vmem:[%s2912_s19 + $0x48] sm:$0xe]  ;;  %v3223_v32 = vld [vmem:[%s2912_s19 + $0x2c] ss:$0 sps:$4 sm:$0x11]  }
  0x63   : > { %v582_v13 = vor.u32 %v581_v63, %v577_v62  ;;  %v839_v28 = vsel %vm800_vm0, %v837_v16, %v838_v17  ;;  %v1325_v56 = vrot.slane %v2566_v47, 1  ;;  %v1609_v16 = vshll.u32 %v3187_v0, 16 }
  0x64   : > { %v2614_v19 = vcombine.low %v2470_v9, %v2427_v45 }
  0x65   : > { %1387 = vrot.lane.b32.xlu1 %v1354_v33, %s2860_s21  ;;  %v587_v26 = vsel %vm527_vm1, %v582_v13, %v586_v14  ;;  %v1186_v33 = vshrl.u32 %v2542_v8, 16 }
  0x66   : > { %1371 = vrot.lane.b32.xlu0 %v1330_v36, %s2860_s21  ;;  %v1090_v36 = vshrl.u32 %v2534_v11, 16  ;;  %v1837_v38 = vrot.slane %v2614_v19, 1 }
  0x67   : > { %v1191_v48 = vor.u32 %v1190_v37, %v1186_v33  ;;  %v1862_v37 = vrot.slane %v3182_v59, 1 }
  0x68   : > { %v1095_v52 = vor.u32 %v1094_v39, %v1090_v36  ;;  %v1838_v39 = vrot.slane %v3187_v0, 1 }
  0x69   : > { %1499 = vrot.lane.b32.xlu1 %v2591_v4, %s2864_s25  ;;  %v251_v4 = vld [vmem:[%s2912_s19 + $0x30] sm:$0xe]  ;;  %v1196_v60 = vsel %vm527_vm1, %v1191_v48, %v1195_v49  ;;  %v3239_v48 = vld [vmem:[%s2912_s19 + $0x94] sm:$0xf] }
  0x6a   : > { %1483 = vrot.lane.b32.xlu0 %v2583_v7, %s2864_s25  ;;  %v1866_v7 = vsel %vm800_vm0, %v1864_v50, %v1865_v51  ;;  %v2518_v15 = vcombine.low %v251_v4, %v3121_v25  ;;  %v814_v25 = vrot.slane %v2748_v46, 1  ;;  %v2574_v46 = vcombine.low %v2414_v30, %v2379_v1  ;;  %v3196_v4 = vld [vmem:[%s2912_s19 + $0x28] sm:$0xf] }
  0x6b   : > { %v2590_v50 = vcombine.low %v2442_v41, %v2443_v43  ;;  %v2582_v51 = vcombine.low %v2426_v44, %v2427_v45  ;;  %v1100_v1 = vsel %vm527_vm1, %v1095_v52, %v1099_v53  ;;  %v3210_v17 = vcombine.low %v205_v5, %v3196_v4 }
  0x6c   : > { %v813_v27 = vrot.slane %v2518_v15, 1  ;;  %v1611_v30 = vrot.slane %v1609_v16, 1  ;;  %v668_v41 = vshll.u32 %v3218_v24, 16  ;;  %v572_v53 = vshll.u32 %v3223_v32, 16 }
  0x6d   : > { %1771 = vrot.lane.b32.xlu1 %v1720_v54, %s2865_s26  ;;  %v1349_v54 = vrot.slane %v2574_v46, 1  ;;  %v1700_v62 = vshll.u32 %v2590_v50, 16  ;;  %v1604_v63 = vshll.u32 %v2582_v51, 16  ;;  %v1698_v10 = vshrl.u32 %v2590_v50, 16 }
  0x6e   : > { %1755 = vrot.lane.b32.xlu0 %v1624_v2, %s2865_s26  ;;  %v815_v42 = vsel %vm800_vm0, %v813_v27, %v814_v25  ;;  %v221_v2 = vld [vmem:[%s2912_s19 + $0x84] sm:$0xf]  ;;  %v1602_v14 = vshrl.u32 %v2582_v51, 16  ;;  %v567_v33 = vshll.u32 %v3210_v17, 16  ;;  %v565_v47 = vshrl.u32 %v3210_v17, 16 }
  0x6f   : > { %v1351_v6 = vsel %vm800_vm0, %v1349_v54, %v1350_v55  ;;  %v3206_v13 = vcombine.low %v221_v2, %v3192_v3  ;;  %v1606_v15 = vrot.slane %v1604_v63, 1  ;;  %v2360_v54 = vld [vmem:[%s2912_s19 + $0x30] sm:$0xf]  ;;  %v3247_v55 = vld [vmem:[%s2912_s19 + $0x34] sm:$0xf]  ;;  %v574_v5 = vrot.slane %v572_v53, 1 }
  0x70   : > { %v569_v52 = vrot.slane %v567_v33, 1  ;;  %v3258_v63 = vcombine.low %v2360_v54, %v3247_v55  ;;  %v811_v16 = vrot.slane %v3223_v32, 1 }
  0x71   : > { %1899 = vrot.lane.b32.xlu1 %v1866_v7, %s2866_s27  ;;  %v2478_v7 = vld [vmem:[%s2912_s19 + $0xa8] sm:$0xe]  ;;  %v663_v25 = vshll.u32 %v3206_v13, 16  ;;  %v661_v40 = vshrl.u32 %v3206_v13, 16 }
  0x72   : > { %1883 = vrot.lane.b32.xlu0 %v1842_v12, %s2866_s27  ;;  %v1705_v12 = vshll.u32 %v3182_v59, 16  ;;  %v2622_v18 = vcombine.low %v2478_v7, %v2443_v43  ;;  %v2376_v43 = vld [vmem:[%s2912_s19 + $0x90] sm:$0xf]  ;;  %v570_v2 = vor.u32 %v569_v52, %v565_v47  ;;  %v3263_v7 = vld [vmem:[%s2912_s19 + $0x98] ss:$0 sps:$4 sm:$0x11]  }
  0x73   : > { %v665_v46 = vrot.slane %v663_v25, 1  ;;  %v1078_v33 = vshrl.u32 %v3258_v63, 16  ;;  %v2424_v47 = vld [vmem:[%s2912_s19 + $0x3c] sm:$0xf] }
  0x74   : > { %v1707_v27 = vrot.slane %v1705_v12, 1  ;;  %v1861_v36 = vrot.slane %v2622_v18, 1  ;;  %v1080_v12 = vshll.u32 %v3258_v63, 16  ;;  %v3276_v18 = vld [vmem:[%s2912_s19 + $0x38] ss:$0 sps:$4 sm:$0x11]  }
  0x75   : > { %744 = vrot.lane.b32.xlu1 %v683_v21, %s2862_s23  ;;  %v666_v59 = vor.u32 %v665_v46, %v661_v40  ;;  %v1085_v40 = vshll.u32 %v3276_v18, 16 }
  0x76   : > { %728 = vrot.lane.b32.xlu0 %v587_v26, %s2862_s23 }
  0x79   : > { %873 = vrot.lane.b32.xlu1 %v839_v28, %s2861_s22  ;;  %v1607_v28 = vor.u32 %v1606_v15, %v1602_v14 }
  0x7a   : > { %857 = vrot.lane.b32.xlu0 %v815_v42, %s2861_s22  ;;  %v258_v42 = vld [vmem:[%s2912_s19 + $0x84] sm:$0xe] }
  0x7d   : > { %985 = vrot.lane.b32.xlu1 %v2542_v8, %s2859_s20  ;;  %v1327_v8 = vsel %vm800_vm0, %v1325_v56, %v1326_v58  ;;  %v1863_v56 = vsel %vm800_vm0, %v1861_v36, %v1862_v37  ;;  %v3253_v58 = vcombine.low %v2376_v43, %v3239_v48  ;;  %v1082_v36 = vrot.slane %v1080_v12, 1  ;;  %v2440_v37 = vld [vmem:[%s2912_s19 + $0x9c] sm:$0xf] }
  0x7e   : > { %969 = vrot.lane.b32.xlu0 %v2534_v11, %s2859_s20  ;;  %v1702_v11 = vrot.slane %v1700_v62, 1  ;;  %v2525_v62 = vcombine.low %v258_v42, %v3192_v3 }
  0x7f   : > { %v1176_v3 = vshll.u32 %v3253_v58, 16  ;;  %v1174_v25 = vshrl.u32 %v3253_v58, 16 }
  0x80   : > { %v1703_v26 = vor.u32 %v1702_v11, %v1698_v10  ;;  %v834_v10 = vrot.slane %v2525_v62, 1  ;;  %v835_v11 = vrot.slane %v3218_v24, 1 }
  0x81   : > { %1257 = vrot.lane.b32.xlu1 %v1196_v60, %s2863_s24  ;;  %v670_v60 = vrot.slane %v668_v41, 1 }
  0x82   : > { %1241 = vrot.lane.b32.xlu0 %v1100_v1, %s2863_s24  ;;  %v1708_v45 = vsel %vm527_vm1, %v1703_v26, %v1707_v27  ;;  %v1839_v1 = vsel %vm800_vm0, %v1837_v38, %v1838_v39  ;;  %v2413_v26 = vld [vmem:[%s2912_s19 + $0x90] sm:$0xe]  ;;  %v836_v32 = vsel %vm800_vm0, %v834_v10, %v835_v11  ;;  %v3290_v38 = vld [vmem:[%s2912_s19 + $0xa0] sm:$0xf]  ;;  %v3337_v11 = vld [vmem:[%s2912_s19 + $0x7c] sm:$0xf] }
  0x83   : > { %v671_v9 = vsel %vm527_vm1, %v666_v59, %v670_v60  ;;  %v2405_v27 = vld [vmem:[%s2912_s19 + $0x30] sm:$0xe]  ;;  %v3305_v52 = vcombine.low %v2440_v37, %v3290_v38 }
  0x84   : > { %v2565_v46 = vcombine.low %v2405_v27, %v3247_v55 }
  0x85   : > { %1385 = vrot.lane.b32.xlu1 %v1351_v6, %s2860_s21  ;;  %v3213_v21 = vpop.permute.xlu1 %991 }
  0x86   : > { %1369 = vrot.lane.b32.xlu0 %v1327_v8, %s2860_s21 }
  0x87   : > { %v3215_v22 = vpop.permute.xlu0 %975 }
  0x89   : > { %1497 = vrot.lane.b32.xlu1 %v2590_v50, %s2864_s25  ;;  %v1612_v50 = vsel %vm527_vm1, %v1607_v28, %v1611_v30  ;;  %v1178_v28 = vrot.slane %v1176_v3, 1  ;;  %v1181_v30 = vshll.u32 %v3263_v7, 16 }
  0x8a   : > { %1481 = vrot.lane.b32.xlu0 %v2582_v51, %s2864_s25  ;;  %v250_v51 = vld [vmem:[%s2912_s19 + $0x24] sm:$0xe] }
  0x8b   : > { %v3234_v44 = vpop.permute.xlu0 %1375  ;;  %v3241_v49 = vpop.permute.xlu1 %863  ;;  %v2517_v6 = vcombine.low %v250_v51, %v3196_v4  ;;  %v575_v4 = vsel %vm527_vm1, %v570_v2, %v574_v5  ;;  %v1183_v53 = vrot.slane %v1181_v30, 1  ;;  %v1323_v2 = vrot.slane %v3276_v18, 1  ;;  %v3344_v18 = vld [vmem:[%s2912_s19 + $0x1c] sm:$0xf] }
  0x8d   : > { %1769 = vrot.lane.b32.xlu1 %v1708_v45, %s2865_s26  ;;  %v810_v15 = vrot.slane %v2517_v6, 1  ;;  %v2573_v45 = vcombine.low %v2413_v26, %v3239_v48  ;;  %v1083_v48 = vor.u32 %v1082_v36, %v1078_v33  ;;  %v2477_v26 = vld [vmem:[%s2912_s19 + $0x9c] sm:$0xe] }
  0x8e   : > { %1753 = vrot.lane.b32.xlu0 %v1612_v50, %s2865_s26  ;;  %v3301_v50 = vld [vmem:[%s2912_s19 + $0x40] sm:$0xf] }
  0x8f   : > { %v880_v0 = vpop.permute.xlu1 %879  ;;  %v812_v39 = vsel %vm800_vm0, %v810_v15, %v811_v16  ;;  %v3313_v59 = vcombine.low %v2424_v47, %v3301_v50  ;;  %v1346_v62 = vrot.slane %v2573_v45, 1  ;;  %v1686_v15 = vshrl.u32 %v3305_v52, 16  ;;  %v203_v16 = vld [vmem:[%s2912_s19 + $0x18] sm:$0xf] }
  0x90   : > { %v735_v8 = vpop.permute.xlu0 %734 }
  0x91   : > { %1897 = vrot.lane.b32.xlu1 %v1863_v56, %s2866_s27  ;;  %v1921_v41 = vsel %vm1905_vm2, %v2940_v23, %v735_v8  ;;  %v1179_v23 = vor.u32 %v1178_v28, %v1174_v25  ;;  %v1087_v56 = vrot.slane %v1085_v40, 1  ;;  %v1592_v10 = vshll.u32 %v3313_v59, 16 }
  0x92   : > { %1881 = vrot.lane.b32.xlu0 %v1839_v1, %s2866_s27  ;;  %v1954_v54 = vsel %vm1938_vm3, %v1921_v41, %v3241_v49  ;;  %v1322_v1 = vrot.slane %v2565_v46, 1  ;;  %v3321_v49 = vld [vmem:[%s2912_s19 + $0xa4] ss:$0 sps:$4 sm:$0x11]   ;;  %v1590_v25 = vshrl.u32 %v3313_v59, 16  ;;  %v3364_v40 = vcombine.low %v203_v16, %v3344_v18 }
  0x93   : > { %v3271_v14 = vpop.permute.xlu1 %1391  ;;  %v1987_v6 = vsel %vm1971_vm4, %v1954_v54, %v3215_v22  ;;  %v1184_v8 = vsel %vm527_vm1, %v1179_v23, %v1183_v53  ;;  %v219_v22 = vld [vmem:[%s2912_s19 + $0x78] sm:$0xf] }
  0x94   : > { %v751_v19 = vpop.permute.xlu0 %750 }
  0x95   : > { %v1937_v24 = vsel %vm1905_vm2, %v2945_v29, %v751_v19  ;;  %742 = vrot.lane.b32.xlu1 %v671_v9, %s2862_s23  ;;  %v1088_v9 = vsel %vm527_vm1, %v1083_v48, %v1087_v56  ;;  %v3376_v48 = vld [vmem:[%s2912_s19 + $0x80] ss:$0 sps:$4 sm:$0x11]  }
  0x96   : > { %726 = vrot.lane.b32.xlu0 %v575_v4, %s2862_s23  ;;  %v1970_v42 = vsel %vm1938_vm3, %v1937_v24, %v880_v0  ;;  %v1347_v0 = vrot.slane %v3263_v7, 1  ;;  %v3330_v7 = vld [vmem:[%s2912_s19 + $0x44] ss:$0 sps:$4 sm:$0x11]   ;;  %v1324_v4 = vsel %vm800_vm0, %v1322_v1, %v1323_v2  ;;  %v1693_v24 = vshll.u32 %v3321_v49, 16 }
  0x97   : > { %v1264_v29 = vpop.permute.xlu1 %1263  ;;  %v2003_v55 = vsel %vm1971_vm4, %v1970_v42, %v3213_v21  ;;  %v1688_v21 = vshll.u32 %v3305_v52, 16  ;;  %v1597_v33 = vshll.u32 %v3330_v7, 16  ;;  %v3382_v56 = vld [vmem:[%s2912_s19 + $0x20] ss:$0 sps:$4 sm:$0x11]   ;;  %v1835_v2 = vrot.slane %v3330_v7, 1 }
  0x98   : > { %v1248_v43 = vpop.permute.xlu0 %1247  ;;  %v2036_v5 = vsel %vm2004_vm5, %v2003_v55, %v1264_v29  ;;  %v1348_v12 = vsel %vm800_vm0, %v1346_v62, %v1347_v0  ;;  %v1695_v53 = vrot.slane %v1693_v24, 1  ;;  %v1859_v0 = vrot.slane %v3321_v49, 1  ;;  %v249_v49 = vld [vmem:[%s2912_s19 + $0x18] sm:$0xe] }
  0x99   : > { %871 = vrot.lane.b32.xlu1 %v836_v32, %s2861_s22  ;;  %v2069_v19 = vsel %vm2037_vm6, %v2036_v5, %v3271_v14  ;;  %v1690_v27 = vrot.slane %v1688_v21, 1  ;;  %v2469_v32 = vld [vmem:[%s2912_s19 + $0x3c] sm:$0xe]  ;;  %v3359_v14 = vcombine.low %v219_v22, %v3337_v11  ;;  %v257_v5 = vld [vmem:[%s2912_s19 + $0x78] sm:$0xe] }
  0x9a   : > { %855 = vrot.lane.b32.xlu0 %v812_v39, %s2861_s22  ;;  %v1594_v39 = vrot.slane %v1592_v10, 1  ;;  %v2613_v46 = vcombine.low %v2469_v32, %v3301_v50  ;;  %v555_v50 = vshll.u32 %v3364_v40, 16  ;;  %v560_v10 = vshll.u32 %v3382_v56, 16  ;;  %v2374_v22 = vld [vmem:[%s2912_s19 + $0x84] sm:$0xf] }
  0x9b   : > { %v1504_v51 = vpop.permute.xlu1 %1503  ;;  %v1691_v23 = vor.u32 %v1690_v27, %v1686_v15  ;;  %v651_v54 = vshll.u32 %v3359_v14, 16  ;;  %v649_v21 = vshrl.u32 %v3359_v14, 16  ;;  %v2524_v16 = vcombine.low %v257_v5, %v3337_v11 }
  0x9c   : > { %v1488_v60 = vpop.permute.xlu0 %1487  ;;  %v2102_v28 = vsel %vm2070_vm7, %v2069_v19, %v1504_v51  ;;  %v1595_v55 = vor.u32 %v1594_v39, %v1590_v25  ;;  %v1599_v51 = vrot.slane %v1597_v33, 1  ;;  %v1834_v1 = vrot.slane %v2613_v46, 1  ;;  %v2404_v46 = vld [vmem:[%s2912_s19 + $0x24] sm:$0xe] }
  0x9d   : > { %983 = vrot.lane.b32.xlu1 %v3253_v58, %s2859_s20  ;;  %v2020_v58 = vsel %vm2004_vm5, %v1987_v6, %v1248_v43  ;;  %v2621_v43 = vcombine.low %v2477_v26, %v3290_v38  ;;  %v1696_v6 = vsel %vm527_vm1, %v1691_v23, %v1695_v53  ;;  %v2516_v27 = vcombine.low %v249_v49, %v3344_v18  ;;  %v2792_v23 = vld [vmem:[%s2912_s19 + $0x2c] ss:$0 sps:$4 sm:$0x11]   ;;  %v3442_v49 = vld [vmem:[%s2912_s19 + $0x34] sm:$0xf] }
  0x9e   : > { %967 = vrot.lane.b32.xlu0 %v3258_v63, %s2859_s20  ;;  %v2053_v30 = vsel %vm2037_vm6, %v2020_v58, %v3234_v44  ;;  %v553_v58 = vshrl.u32 %v3364_v40, 16  ;;  %v1600_v7 = vsel %vm527_vm1, %v1595_v55, %v1599_v51  ;;  %v562_v32 = vrot.slane %v560_v10, 1  ;;  %v2438_v55 = vld [vmem:[%s2912_s19 + $0x90] sm:$0xf]  ;;  %v3433_v51 = vld [vmem:[%s2912_s19 + $0x94] sm:$0xf] }
  0x9f   : > { %v1776_v3 = vpop.permute.xlu1 %1775  ;;  %v2086_v36 = vsel %vm2070_vm7, %v2053_v30, %v1488_v60  ;;  %v1858_v62 = vrot.slane %v2621_v43, 1  ;;  %v831_v11 = vrot.slane %v2524_v16, 1  ;;  %v807_v39 = vrot.slane %v2516_v27, 1 }
  0xa0   : > { %v1760_v63 = vpop.permute.xlu0 %1759  ;;  %v2135_v37 = vsel %vm2103_vm8, %v2102_v28, %v1776_v3  ;;  %v1836_v28 = vsel %vm800_vm0, %v1834_v1, %v1835_v2 }
  0xa1   : > { %1255 = vrot.lane.b32.xlu1 %v1184_v8, %s2863_s24  ;;  %v2119_v44 = vsel %vm2103_vm8, %v2086_v36, %v1760_v63  ;;  %v653_v8 = vrot.slane %v651_v54, 1  ;;  %v2375_v63 = vld [vmem:[%s2912_s19 + $0x88] sm:$0xf]  ;;  %v1860_v15 = vsel %vm800_vm0, %v1858_v62, %v1859_v0 }
  0xa2   : > { %1239 = vrot.lane.b32.xlu0 %v1088_v9, %s2863_s24  ;;  %v557_v9 = vrot.slane %v555_v50, 1  ;;  %v2540_v24 = vcombine.low %v2374_v22, %v2375_v63 }
  0xa3   : > { %v1904_v29 = vpop.permute.xlu1 %1903  ;;  %v654_v19 = vor.u32 %v653_v8, %v649_v21 }
  0xa4   : > { %v1888_v41 = vpop.permute.xlu0 %1887  ;;  %v2168_v42 = vsel %vm2136_vm9, %v2135_v37, %v1904_v29  ;;  %v558_v30 = vor.u32 %v557_v9, %v553_v58  ;;  %v832_v37 = vrot.slane %v3376_v48, 1  ;;  %v2412_v29 = vld [vmem:[%s2912_s19 + $0x84] sm:$0xe]  ;;  %v1162_v50 = vshrl.u32 %v2540_v24, 16  ;;  %v2422_v58 = vld [vmem:[%s2912_s19 + $0x30] sm:$0xf] }
  0xa5   : > { %1383 = vrot.lane.b32.xlu1 %v1348_v12, %s2860_s21  ;;  %2648 = vmatprep.subr.msk.bf16.mxu0 %vm2176_vm10, %v2168_v42  ;;  %v2152_v45 = vsel %vm2136_vm9, %v2119_v44, %v1888_v41  ;;  %v808_v44 = vrot.slane %v3382_v56, 1  ;;  %v1164_v41 = vshll.u32 %v2540_v24, 16  ;;  %v2791_v42 = vld [vmem:[%s2912_s19 + $0x8c] ss:$0 sps:$4 sm:$0x11]   ;;  %v2572_v54 = vcombine.low %v2412_v29, %v2375_v63 }
  0xa6   : > { %1367 = vrot.lane.b32.xlu0 %v1324_v4, %s2860_s21  ;;  %v2194_v47 = vsel %vm2176_vm10, %v2152_v45, 0  ;;  %v2359_v4 = vld [vmem:[%s2912_s19 + $0x28] sm:$0xf]  ;;  %v563_v45 = vsel %vm527_vm1, %v558_v30, %v562_v32  ;;  %v1169_v0 = vshll.u32 %v2791_v42, 16  ;;  %v1344_v9 = vrot.slane %v2791_v42, 1 }
  0xa7   : > { %2631 = vmatpush3.bf16.xpose.msra.mxu0 %v2194_v47  ;;  %v3379_v38 = vpop.permute.xlu1 %748  ;;  %v2564_v56 = vcombine.low %v2404_v46, %v2359_v4  ;;  %v1166_v62 = vrot.slane %v1164_v41, 1  ;;  %v809_v2 = vsel %vm800_vm0, %v807_v39, %v808_v44  ;;  %v3456_v32 = vld [vmem:[%s2912_s19 + $0x98] ss:$0 sps:$4 sm:$0x11]   ;;  %v3477_v39 = vld [vmem:[%s2912_s19 + $0x70] sm:$0xf] }
  0xa8   : > { %v3385_v60 = vpop.permute.xlu0 %732  ;;  %v1171_v22 = vrot.slane %v1169_v0, 1  ;;  %v3485_v46 = vld [vmem:[%s2912_s19 + $0x10] sm:$0xf] }
  0xa9   : > { %1495 = vrot.lane.b32.xlu1 %v3305_v52, %s2864_s25  ;;  %v656_v52 = vshll.u32 %v3376_v48, 16  ;;  %v833_v48 = vsel %vm800_vm0, %v831_v11, %v832_v37  ;;  %v1167_v10 = vor.u32 %v1166_v62, %v1162_v50  ;;  %v1319_v63 = vrot.slane %v2564_v56, 1  ;;  %v2468_v56 = vld [vmem:[%s2912_s19 + $0x30] sm:$0xe] }
  0xaa   : > { %1479 = vrot.lane.b32.xlu0 %v3313_v59, %s2864_s25  ;;  %v2358_v59 = vld [vmem:[%s2912_s19 + $0x24] sm:$0xf]  ;;  %v1919_v11 = vsel %vm1905_vm2, %v2994_v31, %v3385_v60 }
  0xab   : > { %v3399_v3 = vpop.permute.xlu1 %877  ;;  %v658_v26 = vrot.slane %v656_v52, 1  ;;  %v2532_v33 = vcombine.low %v2358_v59, %v2359_v4  ;;  %v3438_v52 = vcombine.low %v2438_v55, %v3433_v51  ;;  %v1320_v59 = vrot.slane %v2792_v23, 1 }
  0xac   : > { %v3405_v12 = vpop.permute.xlu0 %861  ;;  %v1172_v29 = vsel %vm527_vm1, %v1167_v10, %v1171_v22  ;;  %v3514_v10 = vld [vmem:[%s2912_s19 + $0x74] ss:$0 sps:$4 sm:$0x11]  }
  0xad   : > { %1767 = vrot.lane.b32.xlu1 %v1696_v6, %s2865_s26  ;;  %v659_v18 = vsel %vm527_vm1, %v654_v19, %v658_v26  ;;  %v1068_v47 = vshll.u32 %v2532_v33, 16  ;;  %v1066_v21 = vshrl.u32 %v2532_v33, 16  ;;  %v1073_v6 = vshll.u32 %v2792_v23, 16 }
  0xae   : > { %1751 = vrot.lane.b32.xlu0 %v1600_v7, %s2865_s26  ;;  %v1343_v7 = vrot.slane %v2572_v54, 1  ;;  %v3447_v19 = vcombine.low %v2422_v58, %v3442_v49  ;;  %v1676_v27 = vshll.u32 %v3438_v52, 16  ;;  %v1681_v54 = vshll.u32 %v3456_v32, 16 }
  0xaf   : > { %v3414_v25 = vpop.permute.xlu1 %989  ;;  %v1070_v5 = vrot.slane %v1068_v47, 1  ;;  %v1075_v16 = vrot.slane %v1073_v6, 1 }
  0xb0   : > { %v3417_v36 = vpop.permute.xlu0 %973  ;;  %v1345_v30 = vsel %vm800_vm0, %v1343_v7, %v1344_v9  ;;  %v2612_v9 = vcombine.low %v2468_v56, %v3442_v49 }
  0xb1   : > { %1895 = vrot.lane.b32.xlu1 %v1860_v15, %s2866_s27  ;;  %v1071_v15 = vor.u32 %v1070_v5, %v1066_v21 }
  0xb2   : > { %1879 = vrot.lane.b32.xlu0 %v1836_v28, %s2866_s27  ;;  %v1935_v28 = vsel %vm1905_vm2, %v2984_v20, %v3379_v38  ;;  %v1321_v20 = vsel %vm800_vm0, %v1319_v63, %v1320_v59  ;;  %v3467_v38 = vld [vmem:[%s2912_s19 + $0x38] ss:$0 sps:$4 sm:$0x11]   ;;  %v1683_v59 = vrot.slane %v1681_v54, 1 }
  0xb3   : > { %v1262_v43 = vpop.permute.xlu1 %1261  ;;  %v1968_v37 = vsel %vm1938_vm3, %v1935_v28, %v3399_v3  ;;  %v1076_v60 = vsel %vm527_vm1, %v1071_v15, %v1075_v16  ;;  %v1580_v3 = vshll.u32 %v3447_v19, 16  ;;  %v1585_v50 = vshll.u32 %v3467_v38, 16 }
  0xb4   : > { %v1246_v53 = vpop.permute.xlu0 %1245 }
  0xb5   : > { %740 = vrot.lane.b32.xlu1 %v659_v18, %s2862_s23  ;;  %v2001_v18 = vsel %vm1971_vm4, %v1968_v37, %v3414_v25  ;;  %v201_v25 = vld [vmem:[%s2912_s19 + $0xc] sm:$0xf]  ;;  %v1587_v16 = vrot.slane %v1585_v50, 1  ;;  %v1832_v37 = vrot.slane %v3467_v38, 1 }
  0xb6   : > { %724 = vrot.lane.b32.xlu0 %v563_v45, %s2862_s23  ;;  %v2034_v41 = vsel %vm2004_vm5, %v2001_v18, %v1262_v43  ;;  %v1678_v45 = vrot.slane %v1676_v27, 1  ;;  %v3504_v21 = vcombine.low %v201_v25, %v3485_v46 }
  0xb7   : > { %v1390_v1 = vpop.permute.xlu1 %1389 }
  0xb8   : > { %v1374_v8 = vpop.permute.xlu0 %1373  ;;  %v2067_v23 = vsel %vm2037_vm6, %v2034_v41, %v1390_v1  ;;  %v543_v49 = vshll.u32 %v3504_v21, 16  ;;  %v2356_v41 = vld [vmem:[%s2912_s19 + $0x18] sm:$0xf] }
  0xb9   : > { %869 = vrot.lane.b32.xlu1 %v833_v48, %s2861_s22  ;;  %v2476_v48 = vld [vmem:[%s2912_s19 + $0x90] sm:$0xe] }
  0xba   : > { %853 = vrot.lane.b32.xlu0 %v809_v2, %s2861_s22  ;;  %v1582_v2 = vrot.slane %v1580_v3, 1  ;;  %v2620_v58 = vcombine.low %v2476_v48, %v3433_v51 }
  0xbb   : > { %v1502_v4 = vpop.permute.xlu1 %1501 }
  0xbc   : > { %v1486_v26 = vpop.permute.xlu0 %1485  ;;  %v2100_v55 = vsel %vm2070_vm7, %v2067_v23, %v1502_v4  ;;  %v1855_v28 = vrot.slane %v2620_v58, 1  ;;  %v2411_v58 = vld [vmem:[%s2912_s19 + $0x78] sm:$0xe] }
  0xbd   : > { %981 = vrot.lane.b32.xlu1 %v2540_v24, %s2859_s20  ;;  %v1952_v24 = vsel %vm1938_vm3, %v1919_v11, %v3405_v12  ;;  %v1674_v12 = vshrl.u32 %v3438_v52, 16  ;;  %v1831_v11 = vrot.slane %v2612_v9, 1 }
  0xbe   : > { %965 = vrot.lane.b32.xlu0 %v2532_v33, %s2859_s20  ;;  %v217_v33 = vld [vmem:[%s2912_s19 + $0x6c] sm:$0xf]  ;;  %v1985_v44 = vsel %vm1971_vm4, %v1952_v24, %v3417_v36  ;;  %v1578_v36 = vshrl.u32 %v3447_v19, 16 }
  0xbf   : > { %v1774_v31 = vpop.permute.xlu1 %1773  ;;  %v2018_v47 = vsel %vm2004_vm5, %v1985_v44, %v1246_v53  ;;  %v3499_v53 = vcombine.low %v217_v33, %v3477_v39  ;;  %v1679_v63 = vor.u32 %v1678_v45, %v1674_v12  ;;  %v256_v24 = vld [vmem:[%s2912_s19 + $0x6c] sm:$0xe]  ;;  %v545_v33 = vrot.slane %v543_v49, 1 }
  0xc0   : > { %v1758_v42 = vpop.permute.xlu0 %1757  ;;  %v2051_v43 = vsel %vm2037_vm6, %v2018_v47, %v1374_v8  ;;  %v2133_v0 = vsel %vm2103_vm8, %v2100_v55, %v1774_v31  ;;  %v1583_v15 = vor.u32 %v1582_v2, %v1578_v36  ;;  %v541_v31 = vshrl.u32 %v3504_v21, 16  ;;  %v248_v45 = vld [vmem:[%s2912_s19 + $0xc] sm:$0xe] }
  0xc1   : > { %1253 = vrot.lane.b32.xlu1 %v1172_v29, %s2863_s24  ;;  %v2084_v62 = vsel %vm2070_vm7, %v2051_v43, %v1486_v26  ;;  %v639_v4 = vshll.u32 %v3499_v53, 16  ;;  %v3522_v26 = vld [vmem:[%s2912_s19 + $0x14] ss:$0 sps:$4 sm:$0x11]   ;;  %v637_v29 = vshrl.u32 %v3499_v53, 16  ;;  %v1684_v18 = vsel %vm527_vm1, %v1679_v63, %v1683_v59 }
  0xc2   : > { %1237 = vrot.lane.b32.xlu0 %v1076_v60, %s2863_s24  ;;  %v2117_v5 = vsel %vm2103_vm8, %v2084_v62, %v1758_v42  ;;  %v2373_v60 = vld [vmem:[%s2912_s19 + $0x7c] sm:$0xf]  ;;  %v1588_v38 = vsel %vm527_vm1, %v1583_v15, %v1587_v16  ;;  %v548_v44 = vshll.u32 %v3522_v26, 16  ;;  %v1833_v43 = vsel %vm800_vm0, %v1831_v11, %v1832_v37 }
  0xc3   : > { %v1902_v1 = vpop.permute.xlu1 %1901  ;;  %v2357_v42 = vld [vmem:[%s2912_s19 + $0x1c] sm:$0xf]  ;;  %v546_v55 = vor.u32 %v545_v33, %v541_v31  ;;  %v2571_v16 = vcombine.low %v2411_v58, %v2373_v60  ;;  %v3587_v31 = vld [vmem:[%s2912_s19 + $0x28] sm:$0xf] }
  0xc4   : > { %v2166_v6 = vsel %vm2136_vm9, %v2133_v0, %v1902_v1  ;;  %v1886_v8 = vpop.permute.xlu0 %1885  ;;  %v3555_v54 = vcombine.low %v2356_v41, %v2357_v42  ;;  %v550_v56 = vrot.slane %v548_v44, 1  ;;  %v829_v0 = vrot.slane %v3514_v10, 1  ;;  %v2807_v1 = vld [vmem:[%s2912_s19 + $0x80] ss:$0 sps:$4 sm:$0x11]  }
  0xc5   : > { %v2150_v7 = vsel %vm2136_vm9, %v2117_v5, %v1886_v8  ;;  %1381 = vrot.lane.b32.xlu1 %v1345_v30, %s2860_s21  ;;  %2649 = vmatprep.subr.msk.bf16.mxu0 %vm2176_vm10, %v2166_v6  ;;  %v1856_v30 = vrot.slane %v3456_v32, 1  ;;  %v641_v32 = vrot.slane %v639_v4, 1  ;;  %v2808_v6 = vld [vmem:[%s2912_s19 + $0x20] ss:$0 sps:$4 sm:$0x11]   ;;  %v1157_v15 = vshll.u32 %v2807_v1, 16 }
  0xc6   : > { %1365 = vrot.lane.b32.xlu0 %v1321_v20, %s2860_s21  ;;  %v2192_v22 = vsel %vm2176_vm10, %v2150_v7, 0  ;;  %v644_v20 = vshll.u32 %v3514_v10, 16  ;;  %v1056_v8 = vshll.u32 %v3555_v54, 16  ;;  %v551_v7 = vsel %vm527_vm1, %v546_v55, %v550_v56  ;;  %v2403_v10 = vld [vmem:[%s2912_s19 + $0x18] sm:$0xe] }
  0xc7   : > { %2633 = vmatpush3.bf16.xpose.msra.mxu0 %v2192_v22  ;;  %v3519_v51 = vpop.permute.xlu1 %746  ;;  %v1857_v47 = vsel %vm800_vm0, %v1855_v28, %v1856_v30  ;;  %v642_v23 = vor.u32 %v641_v32, %v637_v29  ;;  %v805_v22 = vrot.slane %v3522_v26, 1  ;;  %v1054_v28 = vshrl.u32 %v3555_v54, 16  ;;  %v2420_v32 = vld [vmem:[%s2912_s19 + $0x24] sm:$0xf] }
  0xc8   : > { %v3525_v27 = vpop.permute.xlu0 %730  ;;  %v646_v48 = vrot.slane %v644_v20, 1  ;;  %v1058_v26 = vrot.slane %v1056_v8, 1  ;;  %v1061_v30 = vshll.u32 %v2808_v6, 16  ;;  %v2563_v29 = vcombine.low %v2403_v10, %v2357_v42  ;;  %v2436_v20 = vld [vmem:[%s2912_s19 + $0x84] sm:$0xf] }
  0xc9   : > { %1493 = vrot.lane.b32.xlu1 %v3438_v52, %s2864_s25  ;;  %v2372_v52 = vld [vmem:[%s2912_s19 + $0x78] sm:$0xf]  ;;  %v1341_v33 = vrot.slane %v2807_v1, 1  ;;  %v1933_v55 = vsel %vm1905_vm2, %v3058_v57, %v3519_v51 }
  0xca   : > { %1477 = vrot.lane.b32.xlu0 %v3447_v19, %s2864_s25  ;;  %v2523_v19 = vcombine.low %v256_v24, %v3477_v39  ;;  %v3551_v25 = vcombine.low %v2372_v52, %v2373_v60  ;;  %v2515_v39 = vcombine.low %v248_v45, %v3485_v46  ;;  %v647_v5 = vsel %vm527_vm1, %v642_v23, %v646_v48  ;;  %v3583_v24 = vld [vmem:[%s2912_s19 + $0x88] sm:$0xf] }
  0xcb   : > { %v3540_v3 = vpop.permute.xlu1 %875  ;;  %v1159_v60 = vrot.slane %v1157_v15, 1  ;;  %v1059_v44 = vor.u32 %v1058_v26, %v1054_v28  ;;  %v1063_v41 = vrot.slane %v1061_v30, 1  ;;  %v3592_v42 = vcombine.low %v2436_v20, %v3583_v24 }
  0xcc   : > { %v3546_v12 = vpop.permute.xlu0 %859  ;;  %v828_v62 = vrot.slane %v2523_v19, 1  ;;  %v1152_v2 = vshll.u32 %v3551_v25, 16  ;;  %v804_v9 = vrot.slane %v2515_v39, 1  ;;  %v1150_v59 = vshrl.u32 %v3551_v25, 16 }
  0xcd   : > { %1765 = vrot.lane.b32.xlu1 %v1684_v18, %s2865_s26  ;;  %v1316_v19 = vrot.slane %v2563_v29, 1  ;;  %v3595_v23 = vcombine.low %v2420_v32, %v3587_v31  ;;  %v1966_v1 = vsel %vm1938_vm3, %v1933_v55, %v3540_v3  ;;  %v1064_v57 = vsel %vm527_vm1, %v1059_v44, %v1063_v41  ;;  %v215_v3 = vld [vmem:[%s2912_s19 + $0x60] sm:$0xf]  ;;  %v3666_v41 = vld [vmem:[%s2912_s19 + $0x68] ss:$0 sps:$4 sm:$0x11]  }
  0xce   : > { %1749 = vrot.lane.b32.xlu0 %v1588_v38, %s2865_s26  ;;  %v1154_v4 = vrot.slane %v1152_v2, 1  ;;  %v830_v49 = vsel %vm800_vm0, %v828_v62, %v829_v0  ;;  %v806_v37 = vsel %vm800_vm0, %v804_v9, %v805_v22  ;;  %v1340_v38 = vrot.slane %v2571_v16, 1  ;;  %v3608_v62 = vld [vmem:[%s2912_s19 + $0x2c] ss:$0 sps:$4 sm:$0x11]  }
  0xcf   : > { %v3557_v36 = vpop.permute.xlu1 %987  ;;  %v1917_v0 = vsel %vm1905_vm2, %v3061_v61, %v3525_v27  ;;  %v1664_v51 = vshll.u32 %v3592_v42, 16  ;;  %v1568_v27 = vshll.u32 %v3595_v23, 16  ;;  %v3636_v9 = vld [vmem:[%s2912_s19 + $0x4] sm:$0xf] }
  0xd0   : > { %v3561_v50 = vpop.permute.xlu0 %971  ;;  %v1155_v52 = vor.u32 %v1154_v4, %v1150_v59  ;;  %v1342_v39 = vsel %vm800_vm0, %v1340_v38, %v1341_v33  ;;  %v1999_v2 = vsel %vm1971_vm4, %v1966_v1, %v3557_v36  ;;  %v1573_v59 = vshll.u32 %v3608_v62, 16  ;;  %v2475_v16 = vld [vmem:[%s2912_s19 + $0x84] sm:$0xe] }
  0xd1   : > { %1893 = vrot.lane.b32.xlu1 %v1857_v47, %s2866_s27  ;;  %v1317_v47 = vrot.slane %v2808_v6, 1  ;;  %v3627_v6 = vld [vmem:[%s2912_s19 + $0x64] sm:$0xf]  ;;  %v1666_v15 = vrot.slane %v1664_v51, 1  ;;  %v1829_v1 = vrot.slane %v3608_v62, 1 }
  0xd2   : > { %1877 = vrot.lane.b32.xlu0 %v1833_v43, %s2866_s27  ;;  %v3598_v43 = vld [vmem:[%s2912_s19 + $0x8c] ss:$0 sps:$4 sm:$0x11]   ;;  %v1160_v56 = vsel %vm527_vm1, %v1155_v52, %v1159_v60  ;;  %v3649_v28 = vcombine.low %v215_v3, %v3627_v6  ;;  %v2619_v52 = vcombine.low %v2475_v16, %v3583_v24  ;;  %v3672_v24 = vld [vmem:[%s2912_s19 + $0x8] ss:$0 sps:$4 sm:$0x11]  }
  0xd3   : > { %v1260_v46 = vpop.permute.xlu1 %1259  ;;  %v1318_v61 = vsel %vm800_vm0, %v1316_v19, %v1317_v47  ;;  %v1669_v36 = vshll.u32 %v3598_v43, 16  ;;  %v536_v3 = vshll.u32 %v3672_v24, 16 }
  0xd4   : > { %v1244_v63 = vpop.permute.xlu0 %1243  ;;  %v2032_v8 = vsel %vm2004_vm5, %v1999_v2, %v1260_v46 }
  0xd5   : > { %738 = vrot.lane.b32.xlu1 %v647_v5, %s2862_s23  ;;  %v1671_v44 = vrot.slane %v1669_v36, 1 }
  0xd6   : > { %722 = vrot.lane.b32.xlu0 %v551_v7, %s2862_s23  ;;  %v199_v7 = vld [vmem:[%s2912_s19] sm:$0xf] }
  0xd7   : > { %v1388_v11 = vpop.permute.xlu1 %1387 }
  0xd8   : > { %v1372_v18 = vpop.permute.xlu0 %1371  ;;  %v2065_v10 = vsel %vm2037_vm6, %v2032_v8, %v1388_v11  ;;  %v1570_v11 = vrot.slane %v1568_v27, 1  ;;  %v247_v8 = vld [vmem:[%s2912_s19] sm:$0xe] }
  0xd9   : > { %867 = vrot.lane.b32.xlu1 %v830_v49, %s2861_s22  ;;  %v2467_v49 = vld [vmem:[%s2912_s19 + $0x24] sm:$0xe]  ;;  %v2514_v16 = vcombine.low %v247_v8, %v3636_v9 }
  0xda   : > { %851 = vrot.lane.b32.xlu0 %v806_v37, %s2861_s22  ;;  %v3654_v37 = vcombine.low %v199_v7, %v3636_v9  ;;  %v2611_v60 = vcombine.low %v2467_v49, %v3587_v31 }
  0xdb   : > { %v1500_v45 = vpop.permute.xlu1 %1499 }
  0xdc   : > { %v1484_v48 = vpop.permute.xlu0 %1483  ;;  %v2098_v4 = vsel %vm2070_vm7, %v2065_v10, %v1500_v45  ;;  %v627_v45 = vshll.u32 %v3649_v28, 16  ;;  %v531_v31 = vshll.u32 %v3654_v37, 16  ;;  %v529_v62 = vshrl.u32 %v3654_v37, 16 }
  0xdd   : > { %979 = vrot.lane.b32.xlu1 %v3551_v25, %s2859_s20  ;;  %v1950_v25 = vsel %vm1938_vm3, %v1917_v0, %v3546_v12  ;;  %v1662_v12 = vshrl.u32 %v3592_v42, 16  ;;  %v1828_v0 = vrot.slane %v2611_v60, 1 }
  0xde   : > { %963 = vrot.lane.b32.xlu0 %v3555_v54, %s2859_s20  ;;  %v1983_v54 = vsel %vm1971_vm4, %v1950_v25, %v3561_v50  ;;  %v1566_v50 = vshrl.u32 %v3595_v23, 16  ;;  %v625_v25 = vshrl.u32 %v3649_v28, 16  ;;  %v629_v2 = vrot.slane %v627_v45, 1 }
  0xdf   : > { %v1772_v5 = vpop.permute.xlu1 %1771  ;;  %v2016_v22 = vsel %vm2004_vm5, %v1983_v54, %v1244_v63  ;;  %v1667_v33 = vor.u32 %v1666_v15, %v1662_v12  ;;  %v533_v27 = vrot.slane %v531_v31, 1  ;;  %v3694_v54 = vld [vmem:[%s2912_s19 + $0x70] sm:$0xf]  ;;  %v1830_v7 = vsel %vm800_vm0, %v1828_v0, %v1829_v1  ;;  %v2434_v31 = vld [vmem:[%s2912_s19 + $0x78] sm:$0xf] }
  0xe0   : > { %v1756_v58 = vpop.permute.xlu0 %1755  ;;  %v2049_v46 = vsel %vm2037_vm6, %v2016_v22, %v1372_v18  ;;  %v2131_v26 = vsel %vm2103_vm8, %v2098_v4, %v1772_v5  ;;  %v1571_v47 = vor.u32 %v1570_v11, %v1566_v50  ;;  %v2370_v5 = vld [vmem:[%s2912_s19 + $0x6c] sm:$0xf]  ;;  %v3701_v12 = vld [vmem:[%s2912_s19 + $0x10] sm:$0xf]  ;;  %v630_v22 = vor.u32 %v629_v2, %v625_v25  ;;  %v2418_v2 = vld [vmem:[%s2912_s19 + $0x18] sm:$0xf] }
  0xe1   : > { %1251 = vrot.lane.b32.xlu1 %v1160_v56, %s2863_s24  ;;  %v2082_v63 = vsel %vm2070_vm7, %v2049_v46, %v1484_v48  ;;  %v1575_v48 = vrot.slane %v1573_v59, 1  ;;  %v1852_v56 = vrot.slane %v2619_v52, 1  ;;  %v1672_v51 = vsel %vm527_vm1, %v1667_v33, %v1671_v44  ;;  %v2825_v11 = vld [vmem:[%s2912_s19 + $0x74] ss:$0 sps:$4 sm:$0x11]  }
  0xe2   : > { %1235 = vrot.lane.b32.xlu0 %v1064_v57, %s2863_s24  ;;  %v2115_v29 = vsel %vm2103_vm8, %v2082_v63, %v1756_v58  ;;  %v255_v57 = vld [vmem:[%s2912_s19 + $0x60] sm:$0xe]  ;;  %v2354_v58 = vld [vmem:[%s2912_s19 + $0xc] sm:$0xf]  ;;  %v2538_v59 = vcombine.low %v2370_v5, %v3694_v54  ;;  %v534_v4 = vor.u32 %v533_v27, %v529_v62  ;;  %v538_v15 = vrot.slane %v536_v3, 1 }
  0xe3   : > { %v1900_v30 = vpop.permute.xlu1 %1899  ;;  %v2522_v50 = vcombine.low %v255_v57, %v3627_v6  ;;  %v2530_v49 = vcombine.low %v2354_v58, %v3701_v12  ;;  %v2826_v52 = vld [vmem:[%s2912_s19 + $0x14] ss:$0 sps:$4 sm:$0x11]   ;;  %v2410_v33 = vld [vmem:[%s2912_s19 + $0x6c] sm:$0xe] }
  0xe4   : > { %v2164_v20 = vsel %vm2136_vm9, %v2131_v26, %v1900_v30  ;;  %v1884_v18 = vpop.permute.xlu0 %1883  ;;  %v826_v30 = vrot.slane %v3666_v41, 1  ;;  %v539_v9 = vsel %vm527_vm1, %v534_v4, %v538_v15  ;;  %v2402_v44 = vld [vmem:[%s2912_s19 + $0xc] sm:$0xe]  ;;  %v1138_v45 = vshrl.u32 %v2538_v59, 16  ;;  %v3731_v57 = vld [vmem:[%s2912_s19 + $0x7c] sm:$0xf] }
  0xe5   : > { %v2148_v32 = vsel %vm2136_vm9, %v2115_v29, %v1884_v18  ;;  %1379 = vrot.lane.b32.xlu1 %v1342_v39, %s2860_s21  ;;  %2650 = vmatprep.subr.msk.bf16.mxu0 %vm2176_vm10, %v2164_v20  ;;  %v1853_v39 = vrot.slane %v3598_v43, 1  ;;  %v1576_v43 = vsel %vm527_vm1, %v1571_v47, %v1575_v48  ;;  %v825_v26 = vrot.slane %v2522_v50, 1  ;;  %v3750_v4 = vld [vmem:[%s2912_s19 + $0x80] ss:$0 sps:$4 sm:$0x11]  }
  0xe6   : > { %1363 = vrot.lane.b32.xlu0 %v1318_v61, %s2860_s21  ;;  %v2190_v38 = vsel %vm2176_vm10, %v2148_v32, 0  ;;  %v1140_v29 = vshll.u32 %v2538_v59, 16  ;;  %v801_v18 = vrot.slane %v2514_v16, 1  ;;  %v802_v32 = vrot.slane %v3672_v24, 1 }
  0xe7   : > { %2635 = vmatpush3.bf16.xpose.msra.mxu0 %v2190_v38  ;;  %v3669_v19 = vpop.permute.xlu1 %744  ;;  %v1854_v36 = vsel %vm800_vm0, %v1852_v56, %v1853_v39  ;;  %v1044_v60 = vshll.u32 %v2530_v49, 16  ;;  %v1145_v48 = vshll.u32 %v2825_v11, 16  ;;  %v1042_v39 = vshrl.u32 %v2530_v49, 16 }
  0xe8   : > { %v3675_v55 = vpop.permute.xlu0 %728  ;;  %v1142_v47 = vrot.slane %v1140_v29, 1  ;;  %v803_v24 = vsel %vm800_vm0, %v801_v18, %v802_v32  ;;  %v1049_v1 = vshll.u32 %v2826_v52, 16  ;;  %v2570_v25 = vcombine.low %v2410_v33, %v3694_v54 }
  0xe9   : > { %1491 = vrot.lane.b32.xlu1 %v3592_v42, %s2864_s25  ;;  %v632_v42 = vshll.u32 %v3666_v41, 16  ;;  %v827_v41 = vsel %vm800_vm0, %v825_v26, %v826_v30  ;;  %v1046_v0 = vrot.slane %v1044_v60, 1  ;;  %v2562_v5 = vcombine.low %v2402_v44, %v3701_v12 }
  0xea   : > { %1475 = vrot.lane.b32.xlu0 %v3595_v23, %s2864_s25  ;;  %v1147_v62 = vrot.slane %v1145_v48, 1  ;;  %v3742_v27 = vcombine.low %v2434_v31, %v3731_v57  ;;  %v1051_v58 = vrot.slane %v1049_v1, 1  ;;  %v1931_v12 = vsel %vm1905_vm2, %v3129_v34, %v3669_v19 }
  0xeb   : > { %v3688_v61 = vpop.permute.xlu1 %873  ;;  %v634_v10 = vrot.slane %v632_v42, 1  ;;  %v3736_v42 = vld [vmem:[%s2912_s19 + $0x1c] sm:$0xf]  ;;  %v1047_v8 = vor.u32 %v1046_v0, %v1042_v39  ;;  %v1314_v50 = vrot.slane %v2826_v52, 1  ;;  %v1915_v15 = vsel %vm1905_vm2, %v3132_v35, %v3675_v55 }
  0xec   : > { %v3696_v23 = vpop.permute.xlu0 %857  ;;  %v2578_v54 = vcombine.low %v2418_v2, %v3736_v42  ;;  %v1964_v16 = vsel %vm1938_vm3, %v1931_v12, %v3688_v61  ;;  %v1652_v26 = vshll.u32 %v3742_v27, 16  ;;  %v1657_v32 = vshll.u32 %v3750_v4, 16 }
  0xed   : > { %1763 = vrot.lane.b32.xlu1 %v1672_v51, %s2865_s26  ;;  %v635_v6 = vsel %vm527_vm1, %v630_v22, %v634_v10  ;;  %v1338_v22 = vrot.slane %v2825_v11, 1  ;;  %v1313_v10 = vrot.slane %v2562_v5, 1  ;;  %v1948_v34 = vsel %vm1938_vm3, %v1915_v15, %v3696_v23  ;;  %v2832_v11 = vld [vmem:[%s2912_s19 + $0x20] ss:$0 sps:$4 sm:$0x11]  }
  0xee   : > { %1747 = vrot.lane.b32.xlu0 %v1576_v43, %s2865_s26  ;;  %v1143_v43 = vor.u32 %v1142_v47, %v1138_v45  ;;  %v1052_v30 = vsel %vm527_vm1, %v1047_v8, %v1051_v58  ;;  %v1556_v35 = vshll.u32 %v2578_v54, 16  ;;  %v1654_v52 = vrot.slane %v1652_v26, 1  ;;  %v2474_v47 = vld [vmem:[%s2912_s19 + $0x78] sm:$0xe] }
  0xef   : > { %v3709_v46 = vpop.permute.xlu1 %985  ;;  %v1315_v18 = vsel %vm800_vm0, %v1313_v10, %v1314_v50  ;;  %v1554_v60 = vshrl.u32 %v2578_v54, 16  ;;  %v1561_v45 = vshll.u32 %v2832_v11, 16  ;;  %v1826_v12 = vrot.slane %v2832_v11, 1 }
  0xf0   : > { %v3713_v63 = vpop.permute.xlu0 %969  ;;  %v1997_v19 = vsel %vm1971_vm4, %v1964_v16, %v3709_v46  ;;  %v2867_v15 = vmov 0  }
  0xf1   : > { %1891 = vrot.lane.b32.xlu1 %v1854_v36, %s2866_s27  ;;  %v1981_v55 = vsel %vm1971_vm4, %v1948_v34, %v3713_v63  ;;  %2690 = vset.pattern.permute.xlu0 %v2867_v15 }
  0xf2   : > { %1875 = vrot.lane.b32.xlu0 %v1830_v7, %s2866_s27  ;;  %v1337_v7 = vrot.slane %v2570_v25, 1  ;;  %v2618_v25 = vcombine.low %v2474_v47, %v3731_v57 }
  0xf3   : > { %v1258_v20 = vpop.permute.xlu1 %1257 }
  0xf4   : > { %v1242_v38 = vpop.permute.xlu0 %1241  ;;  %v2030_v61 = vsel %vm2004_vm5, %v1997_v19, %v1258_v20  ;;  %v1339_v29 = vsel %vm800_vm0, %v1337_v7, %v1338_v22  ;;  %v1849_v58 = vrot.slane %v2618_v25, 1 }
  0xf5   : > { %736 = vrot.lane.b32.xlu1 %v635_v6, %s2862_s23  ;;  %v1148_v6 = vsel %vm527_vm1, %v1143_v43, %v1147_v62  ;;  %v2014_v23 = vsel %vm2004_vm5, %v1981_v55, %v1242_v38  ;;  %v1563_v43 = vrot.slane %v1561_v45, 1 }
  0xf6   : > { %720 = vrot.lane.b32.xlu0 %v539_v9, %s2862_s23  ;;  %v1650_v9 = vshrl.u32 %v3742_v27, 16 }
  0xf7   : > { %v1386_v56 = vpop.permute.xlu1 %1385 }
  0xf8   : > { %v1370_v51 = vpop.permute.xlu0 %1369  ;;  %v2063_v46 = vsel %vm2037_vm6, %v2030_v61, %v1386_v56  ;;  %v1655_v1 = vor.u32 %v1654_v52, %v1650_v9 }
  0xf9   : > { %865 = vrot.lane.b32.xlu1 %v827_v41, %s2861_s22  ;;  %v2047_v63 = vsel %vm2037_vm6, %v2014_v23, %v1370_v51  ;;  %v1558_v41 = vrot.slane %v1556_v35, 1  ;;  %v1659_v51 = vrot.slane %v1657_v32, 1 }
  0xfa   : > { %849 = vrot.lane.b32.xlu0 %v803_v24, %s2861_s22  ;;  %v2466_v24 = vld [vmem:[%s2912_s19 + $0x18] sm:$0xe] }
  0xfb   : > { %v1498_v3 = vpop.permute.xlu1 %1497  ;;  %v1559_v5 = vor.u32 %v1558_v41, %v1554_v60  ;;  %v2610_v62 = vcombine.low %v2466_v24, %v3736_v42  ;;  %v1660_v57 = vsel %vm527_vm1, %v1655_v1, %v1659_v51 }
  0xfc   : > { %v1482_v36 = vpop.permute.xlu0 %1481  ;;  %v2096_v20 = vsel %vm2070_vm7, %v2063_v46, %v1498_v3  ;;  %v3795_v3 = vld [vmem:[%s3910_s1] sm:$0x7] }
  0xfd   : > { %977 = vrot.lane.b32.xlu1 %v2538_v59, %s2859_s20  ;;  %v2080_v33 = vsel %vm2070_vm7, %v2047_v63, %v1482_v36  ;;  %2646 = vmatprep.mubr.msk.bf16.mxu0 %vm2176_vm10, %v3795_v3  ;;  %v1850_v36 = vrot.slane %v3750_v4, 1  ;;  %v1564_v7 = vsel %vm527_vm1, %v1559_v5, %v1563_v43  ;;  %v1825_v22 = vrot.slane %v2610_v62, 1 }
  0xfe   : > { %961 = vrot.lane.b32.xlu0 %v2530_v49, %s2859_s20 }
  0xff   : > { %v1770_v59 = vpop.permute.xlu1 %1769  ;;  %v1851_v50 = vsel %vm800_vm0, %v1849_v58, %v1850_v36 }
 0x100   : > { %v1754_v49 = vpop.permute.xlu0 %1753  ;;  %v2129_v38 = vsel %vm2103_vm8, %v2096_v20, %v1770_v59 }
 0x101   : > { %1249 = vrot.lane.b32.xlu1 %v1148_v6, %s2863_s24  ;;  %v2113_v48 = vsel %vm2103_vm8, %v2080_v33, %v1754_v49  ;;  %v2170_v6 = vld [vmem:[%s3911_s2] sm:$0x3f] }
 0x102   : > { %1233 = vrot.lane.b32.xlu0 %v1052_v30, %s2863_s24 }
 0x103   : > { %v1898_v44 = vpop.permute.xlu1 %1897 }
 0x104   : > { %v2162_v31 = vsel %vm2136_vm9, %v2129_v38, %v1898_v44  ;;  %v1882_v56 = vpop.permute.xlu0 %1881 }
 0x105   : > { %v2146_v39 = vsel %vm2136_vm9, %v2113_v48, %v1882_v56  ;;  %1377 = vrot.lane.b32.xlu1 %v1339_v29, %s2860_s21  ;;  %2651 = vmatprep.subr.msk.bf16.mxu0 %vm2176_vm10, %v2162_v31 }
 0x106   : > { %1361 = vrot.lane.b32.xlu0 %v1315_v18, %s2860_s21  ;;  %v2188_v0 = vsel %vm2176_vm10, %v2146_v39, 0 }
 0x107   : > { %2637 = vmatpush3.bf16.xpose.msra.mxu0 %v2188_v0  ;;  %v743_v2 = vpop.permute.xlu1 %742 }
 0x108   : > { %v727_v8 = vpop.permute.xlu0 %726  ;;  %v1929_v11 = vsel %vm1905_vm2, %v3206_v13, %v743_v2 }
 0x109   : > { %1489 = vrot.lane.b32.xlu1 %v3742_v27, %s2864_s25  ;;  %v1913_v35 = vsel %vm1905_vm2, %v3210_v17, %v727_v8 }
 0x10a   : > { %1473 = vrot.lane.b32.xlu0 %v2578_v54, %s2864_s25  ;;  %v1827_v54 = vsel %vm800_vm0, %v1825_v22, %v1826_v12 }
 0x10b   : > { %v872_v42 = vpop.permute.xlu1 %871 }
 0x10c   : > { %v856_v10 = vpop.permute.xlu0 %855  ;;  %v1962_v55 = vsel %vm1938_vm3, %v1929_v11, %v872_v42 }
 0x10d   : > { %1761 = vrot.lane.b32.xlu1 %v1660_v57, %s2865_s26  ;;  %v1946_v61 = vsel %vm1938_vm3, %v1913_v35, %v856_v10 }
 0x10e   : > { %1745 = vrot.lane.b32.xlu0 %v1564_v7, %s2865_s26 }
 0x10f   : > { %v984_v27 = vpop.permute.xlu1 %983 }
 0x110   : > { %v968_v16 = vpop.permute.xlu0 %967  ;;  %v1995_v49 = vsel %vm1971_vm4, %v1962_v55, %v984_v27 }
 0x111   : > { %1889 = vrot.lane.b32.xlu1 %v1851_v50, %s2866_s27  ;;  %v1979_v9 = vsel %vm1971_vm4, %v1946_v61, %v968_v16 }
 0x112   : > { %1873 = vrot.lane.b32.xlu0 %v1827_v54, %s2866_s27 }
 0x113   : > { %v1256_v4 = vpop.permute.xlu1 %1255 }
 0x114   : > { %v1240_v26 = vpop.permute.xlu0 %1239  ;;  %v2028_v23 = vsel %vm2004_vm5, %v1995_v49, %v1256_v4 }
 0x115   : > { %v2012_v18 = vsel %vm2004_vm5, %v1979_v9, %v1240_v26 }
 0x116   : > { %2173 = vperm.xlu0 %2690, %v2170_v6  }
 0x117   : > { %v1384_v34 = vpop.permute.xlu1 %1383 }
 0x118   : > { %v1368_v19 = vpop.permute.xlu0 %1367  ;;  %v2061_v32 = vsel %vm2037_vm6, %v2028_v23, %v1384_v34 }
 0x119   : > { %v2045_v13 = vsel %vm2037_vm6, %v2012_v18, %v1368_v19 }
 0x11b   : > { %v1496_v59 = vpop.permute.xlu1 %1495 }
 0x11c   : > { %v1480_v30 = vpop.permute.xlu0 %1479  ;;  %v2094_v17 = vsel %vm2070_vm7, %v2061_v32, %v1496_v59 }
 0x11d   : > { %v2078_v63 = vsel %vm2070_vm7, %v2045_v13, %v1480_v30 }
 0x11f   : > { %v1768_v29 = vpop.permute.xlu1 %1767 }
 0x120   : > { %v1752_v46 = vpop.permute.xlu0 %1751  ;;  %v2127_v20 = vsel %vm2103_vm8, %v2094_v17, %v1768_v29 }
 0x121   : > { %v2111_v60 = vsel %vm2103_vm8, %v2078_v63, %v1752_v46 }
 0x123   : > { %v1896_v52 = vpop.permute.xlu1 %1895 }
 0x124   : > { %v2160_v33 = vsel %vm2136_vm9, %v2127_v20, %v1896_v52  ;;  %v1880_v38 = vpop.permute.xlu0 %1879 }
 0x125   : > { %v2144_v44 = vsel %vm2136_vm9, %v2111_v60, %v1880_v38  ;;  %2652 = vmatprep.subr.msk.bf16.mxu0 %vm2176_vm10, %v2160_v33 }
 0x126   : > { %v2186_v41 = vsel %vm2176_vm10, %v2144_v44, 0 }
 0x127   : > { %2639 = vmatpush3.bf16.xpose.msra.mxu0 %v2186_v41  ;;  %v741_v45 = vpop.permute.xlu1 %740 }
 0x128   : > { %v725_v47 = vpop.permute.xlu0 %724  ;;  %v1927_v5 = vsel %vm1905_vm2, %v3359_v14, %v741_v45 }
 0x129   : > { %v1911_v43 = vsel %vm1905_vm2, %v3364_v40, %v725_v47 }
 0x12b   : > { %v870_v48 = vpop.permute.xlu1 %869 }
 0x12c   : > { %v854_v31 = vpop.permute.xlu0 %853  ;;  %v1960_v62 = vsel %vm1938_vm3, %v1927_v5, %v870_v48 }
 0x12d   : > { %v1944_v8 = vsel %vm1938_vm3, %v1911_v43, %v854_v31 }
 0x12f   : > { %v982_v56 = vpop.permute.xlu1 %981 }
 0x130   : > { %v966_v24 = vpop.permute.xlu0 %965  ;;  %v1993_v57 = vsel %vm1971_vm4, %v1960_v62, %v982_v56 }
 0x131   : > { %v1977_v36 = vsel %vm1971_vm4, %v1944_v8, %v966_v24 }
 0x133   : > { %v1254_v39 = vpop.permute.xlu1 %1253 }
 0x134   : > { %v1238_v0 = vpop.permute.xlu0 %1237  ;;  %v2026_v42 = vsel %vm2004_vm5, %v1993_v57, %v1254_v39 }
 0x135   : > { %v2010_v22 = vsel %vm2004_vm5, %v1977_v36, %v1238_v0 }
 0x137   : > { %v1382_v1 = vpop.permute.xlu1 %1381 }
 0x138   : > { %v1366_v51 = vpop.permute.xlu0 %1365  ;;  %v2059_v12 = vsel %vm2037_vm6, %v2026_v42, %v1382_v1 }
 0x139   : > { %v2043_v14 = vsel %vm2037_vm6, %v2010_v22, %v1366_v51 }
 0x13b   : > { %v1494_v25 = vpop.permute.xlu1 %1493 }
 0x13c   : > { %v1478_v2 = vpop.permute.xlu0 %1477  ;;  %v2092_v40 = vsel %vm2070_vm7, %v2059_v12, %v1494_v25 }
 0x13d   : > { %v2076_v10 = vsel %vm2070_vm7, %v2043_v14, %v1478_v2 }
 0x13f   : > { %v1766_v58 = vpop.permute.xlu1 %1765 }
 0x140   : > { %v1750_v7 = vpop.permute.xlu0 %1749  ;;  %v2125_v50 = vsel %vm2103_vm8, %v2092_v40, %v1766_v58 }
 0x141   : > { %v2109_v54 = vsel %vm2103_vm8, %v2076_v10, %v1750_v7 }
 0x143   : > { %v1894_v27 = vpop.permute.xlu1 %1893 }
 0x144   : > { %v2158_v15 = vsel %vm2136_vm9, %v2125_v50, %v1894_v27  ;;  %v1878_v16 = vpop.permute.xlu0 %1877 }
 0x145   : > { %v2142_v4 = vsel %vm2136_vm9, %v2109_v54, %v1878_v16  ;;  %2653 = vmatprep.subr.msk.bf16.mxu0 %vm2176_vm10, %v2158_v15 }
 0x146   : > { %v2184_v6 = vsel %vm2176_vm10, %v2142_v4, 0 }
 0x147   : > { %2641 = vmatpush3.bf16.xpose.msra.mxu0 %v2184_v6  ;;  %v739_v26 = vpop.permute.xlu1 %738 }
 0x148   : > { %v723_v34 = vpop.permute.xlu0 %722  ;;  %v1925_v23 = vsel %vm1905_vm2, %v3499_v53, %v739_v26 }
 0x149   : > { %v1909_v46 = vsel %vm1905_vm2, %v3504_v21, %v723_v34 }
 0x14b   : > { %v868_v19 = vpop.permute.xlu1 %867 }
 0x14c   : > { %v852_v59 = vpop.permute.xlu0 %851  ;;  %v1958_v18 = vsel %vm1938_vm3, %v1925_v23, %v868_v19 }
 0x14d   : > { %v1942_v32 = vsel %vm1938_vm3, %v1909_v46, %v852_v59 }
 0x14f   : > { %v980_v30 = vpop.permute.xlu1 %979 }
 0x150   : > { %v964_v11 = vpop.permute.xlu0 %963  ;;  %v1991_v13 = vsel %vm1971_vm4, %v1958_v18, %v980_v30 }
 0x151   : > { %v1975_v63 = vsel %vm1971_vm4, %v1942_v32, %v964_v11 }
 0x153   : > { %v1252_v35 = vpop.permute.xlu1 %1251 }
 0x154   : > { %v1236_v55 = vpop.permute.xlu0 %1235  ;;  %v2024_v20 = vsel %vm2004_vm5, %v1991_v13, %v1252_v35 }
 0x155   : > { %v2008_v60 = vsel %vm2004_vm5, %v1975_v63, %v1236_v55 }
 0x157   : > { %v1380_v61 = vpop.permute.xlu1 %1379 }
 0x158   : > { %v1364_v49 = vpop.permute.xlu0 %1363  ;;  %v2057_v33 = vsel %vm2037_vm6, %v2024_v20, %v1380_v61 }
 0x159   : > { %v2041_v53 = vsel %vm2037_vm6, %v2008_v60, %v1364_v49 }
 0x15b   : > { %v1492_v29 = vpop.permute.xlu1 %1491 }
 0x15c   : > { %v1476_v9 = vpop.permute.xlu0 %1475  ;;  %v2090_v21 = vsel %vm2070_vm7, %v2057_v33, %v1492_v29 }
 0x15d   : > { %v2074_v38 = vsel %vm2070_vm7, %v2041_v53, %v1476_v9 }
 0x15f   : > { %v1764_v17 = vpop.permute.xlu1 %1763 }
 0x160   : > { %v1748_v52 = vpop.permute.xlu0 %1747  ;;  %v2123_v44 = vsel %vm2103_vm8, %v2090_v21, %v1764_v17 }
 0x161   : > { %v2107_v45 = vsel %vm2103_vm8, %v2074_v38, %v1748_v52 }
 0x163   : > { %v1892_v41 = vpop.permute.xlu1 %1891 }
 0x164   : > { %v2156_v47 = vsel %vm2136_vm9, %v2123_v44, %v1892_v41  ;;  %v1876_v48 = vpop.permute.xlu0 %1875 }
 0x165   : > { %v2140_v31 = vsel %vm2136_vm9, %v2107_v45, %v1876_v48  ;;  %2654 = vmatprep.subr.msk.bf16.mxu0 %vm2176_vm10, %v2156_v47 }
 0x166   : > { %v2182_v56 = vsel %vm2176_vm10, %v2140_v31, 0 }
 0x167   : > { %2643 = vmatpush3.bf16.xpose.msra.mxu0 %v2182_v56  ;;  %v737_v24 = vpop.permute.xlu1 %736 }
 0x168   : > { %v721_v39 = vpop.permute.xlu0 %720  ;;  %v1923_v58 = vsel %vm1905_vm2, %v3649_v28, %v737_v24 }
 0x169   : > { %v1907_v36 = vsel %vm1905_vm2, %v3654_v37, %v721_v39 }
 0x16b   : > { %v866_v0 = vpop.permute.xlu1 %865 }
 0x16c   : > { %v850_v1 = vpop.permute.xlu0 %849  ;;  %v1956_v42 = vsel %vm1938_vm3, %v1923_v58, %v866_v0 }
 0x16d   : > { %v1940_v7 = vsel %vm1938_vm3, %v1907_v36, %v850_v1 }
 0x16f   : > { %v978_v51 = vpop.permute.xlu1 %977 }
 0x170   : > { %v962_v25 = vpop.permute.xlu0 %961  ;;  %v1989_v22 = vsel %vm1971_vm4, %v1956_v42, %v978_v51 }
 0x171   : > { %v1973_v14 = vsel %vm1971_vm4, %v1940_v7, %v962_v25 }
 0x173   : > { %v1250_v2 = vpop.permute.xlu1 %1249 }
 0x174   : > { %v1234_v5 = vpop.permute.xlu0 %1233  ;;  %v2022_v40 = vsel %vm2004_vm5, %v1989_v22, %v1250_v2 }
 0x175   : > { %v2006_v50 = vsel %vm2004_vm5, %v1973_v14, %v1234_v5 }
 0x177   : > { %v1378_v43 = vpop.permute.xlu1 %1377 }
 0x178   : > { %v1362_v62 = vpop.permute.xlu0 %1361  ;;  %v2055_v28 = vsel %vm2037_vm6, %v2022_v40, %v1378_v43 }
 0x179   : > { %v2039_v27 = vsel %vm2037_vm6, %v2006_v50, %v1362_v62 }
 0x17b   : > { %v1490_v8 = vpop.permute.xlu1 %1489 }
 0x17c   : > { %v1474_v57 = vpop.permute.xlu0 %1473  ;;  %v2088_v37 = vsel %vm2070_vm7, %v2055_v28, %v1490_v8 }
 0x17d   : > { %v2072_v54 = vsel %vm2070_vm7, %v2039_v27, %v1474_v57 }
 0x17f   : > { %v1762_v12 = vpop.permute.xlu1 %1761 }
 0x180   : > { %v1746_v10 = vpop.permute.xlu0 %1745  ;;  %v2121_v15 = vsel %vm2103_vm8, %v2088_v37, %v1762_v12 }
 0x181   : > { %v2105_v4 = vsel %vm2103_vm8, %v2072_v54, %v1746_v10 }
 0x183   : > { %v1890_v16 = vpop.permute.xlu1 %1889 }
 0x184   : > { %v2154_v6 = vsel %vm2136_vm9, %v2121_v15, %v1890_v16  ;;  %v1874_v26 = vpop.permute.xlu0 %1873 }
 0x185   : > { %v2138_v34 = vsel %vm2136_vm9, %v2105_v4, %v1874_v26  ;;  %2655 = vmatprep.subr.msk.bf16.mxu0 %vm2176_vm10, %v2154_v6 }
 0x186   : > { %v2180_v19 = vsel %vm2176_vm10, %v2138_v34, 0 }
 0x187   : > { %2645 = vmatpush3.bf16.xpose.msra.mxu0 %v2180_v19 }
 0x18e   : > { %2647 = vmatmul.mubr.msk.bf16.vlgmr.msra.gmra.mxu0 %vm2176_vm10, %v3795_v3 }
 0x191   : > { %v2174_v59 = vpop.permute.xlu0 %2173 }
 0x24e   : > { %v2246_v30 = vpop.f32.mrf.mxu0 }
 0x24f   : > { %v2247_v11 = vadd.f32 %v2246_v30, %v2174_v59 }
 0x250   : > { %v2248_v35 = vpop.f32.mrf.mxu0 }
 0x251   : > { %2253 = vst [vmem:[%s192_s8] sm:$0x3f] %v2247_v11  ;;  %v2249_v55 = vadd.f32 %v2248_v35, %v2174_v59 }
 0x252   : > { %v2250_v61 = vpop.f32.mrf.mxu0 }
 0x253   : > { %2254 = vst [vmem:[%s192_s8 + $0x8] sm:$0x3f] %v2249_v55 }
 0x254   : > { %v2251_v49 = vpop.f32.mrf.mxu0 }
 0x255 PF: > { %s13_s14 = sadd.s32 1, %s2857_s14   ;;  %s3913_s12 = smov %s2853_s13 }
 0x256   : > { %p10_p5 = scmp.ge.s32.totalorder %s13_s14, 4   ;;  %s3914_s13 = smov %s3916_s15 }
 0x258   :  { %12 = sbr.rel (!%p10_p5) target bundleno = 2 (0x2), region = 65 }

</bundles_post_ra>
